<compile_context>
chip_gen: v7x
topology: tpu7x:2x2x1
jax: 0.10.0
libtpu: 0.0.40
codegen_flags: <defaults>
</compile_context>

<pallas_src>
import functools

import jax
import jax.numpy as jnp
import numpy as np
from jax.experimental import pallas as pl
from jax.experimental.pallas import tpu as pltpu


def _ds(start, size, stride):
    if stride == 1:
        return pl.ds(start, size)
    return pl.ds(start, size, stride=stride)


def _conv_stats_kernel(x_ref, w_ref, y_ref, psum_ref, psq_ref, *,
                       taps, tile_h, wo, stride):
    """Conv for `tile_h` output rows of one batch element (tap-wise MXU
    matmuls, f32 accumulation) + per-tile BN partial sums.  The intermediate
    activation is stored channel-major (Cout, tile_h*Wo) so every downstream
    block is lane-dense and the final NCHW output needs no transpose."""
    i = pl.program_id(1)
    # first padded input row needed by this output-row tile (before kh offset)
    row0 = pl.multiple_of(i * tile_h, tile_h) * stride

    cout = w_ref.shape[-1]
    acc = jnp.zeros((tile_h * wo, cout), jnp.float32)
    for k, (kh, kw) in enumerate(taps):          # unrolled over KH*KW taps
        # tap view sliced from the resident padded image block (bf16)
        xt = x_ref[0, _ds(row0 + kh, tile_h, stride), _ds(kw, wo, stride), :]
        xt = xt.reshape(tile_h * wo, xt.shape[-1])          # (tile_hw, Cin)
        acc += jnp.dot(xt, w_ref[k], preferred_element_type=jnp.float32)

    # per-channel partial sums for this (batch, tile) block (reduced in f32
    # by the wrapper -> grid stays fully parallel, no resident accumulator)
    psum_ref[0, 0] = jnp.sum(acc, axis=0, keepdims=True)
    psq_ref[0, 0] = jnp.sum(acc * acc, axis=0, keepdims=True)
    # Channel-major bf16 intermediate: (Cout, tile_hw), lane-dense store.
    y_ref[0] = jnp.transpose(acc).astype(y_ref.dtype)


def _bn_relu_kernel(y_ref, scale_ref, shift_ref, o_ref):
    """Elementwise folded-BN affine + ReLU on channel-major blocks, f32 math."""
    y = y_ref[0].astype(jnp.float32)                 # (Cout, tile_hw)
    z = y * scale_ref[...] + shift_ref[...]          # (Cout, 1) broadcasts
    o_ref[0] = jnp.maximum(z, 0.0).astype(o_ref.dtype)


def _pick_tile_h(ho, wo, target_rows=2048):
    """Largest divisor d of Ho with d*Wo a multiple of 128 (lane-dense last
    dim) and d*Wo <= target_rows; falls back to the smallest lane-aligned
    divisor, then to the full Ho (block == full dim is always legal)."""
    best = ho
    for d in range(ho, 0, -1):
        if ho % d:
            continue
        if (d * wo) % 128 != 0:
            continue
        if d * wo <= target_rows:
            return d
        best = d
    return best


def conv_bn_relu(x_nchw, w_oihw, gamma, beta, *, stride=1, padding=1,
                 eps=1e-5, tile_h=None):
    N, C_in, H, W = x_nchw.shape
    C_out, c_in2, KH, KW = w_oihw.shape
    assert c_in2 == C_in
    Ho = (H + 2 * padding - KH) // stride + 1
    Wo = (W + 2 * padding - KW) // stride + 1
    HW = Ho * Wo
    n_taps = KH * KW
    taps = tuple((kh, kw) for kh in range(KH) for kw in range(KW))

    if tile_h is None:
        tile_h = _pick_tile_h(Ho, Wo)
    assert Ho % tile_h == 0, (Ho, tile_h)
    tile_hw = tile_h * Wo
    assert tile_hw == HW or tile_hw % 128 == 0, (tile_hw,)
    n_h = Ho // tile_h

    # NCHW -> padded NHWC, bf16 for the MXU (layout glue only).
    x = jnp.transpose(x_nchw, (0, 2, 3, 1))
    xp = jnp.pad(x, ((0, 0), (padding, padding), (padding, padding), (0, 0)))
    xp = xp.astype(jnp.bfloat16)
    Hp, Wp = H + 2 * padding, W + 2 * padding

    # OIHW -> (KH*KW, Cin, Cout) bf16; stays resident via constant index_map.
    w_taps = jnp.transpose(w_oihw, (2, 3, 1, 0)).reshape(n_taps, C_in, C_out)
    w_taps = w_taps.astype(jnp.bfloat16)

    vmem_limit = 48 * 1024 * 1024

    conv_fn = pl.pallas_call(
        functools.partial(_conv_stats_kernel, taps=taps, tile_h=tile_h,
                          wo=Wo, stride=stride),
        out_shape=(
            jax.ShapeDtypeStruct((N, C_out, HW), jnp.bfloat16),      # y (CM)
            jax.ShapeDtypeStruct((N, n_h, 1, C_out), jnp.float32),   # sum
            jax.ShapeDtypeStruct((N, n_h, 1, C_out), jnp.float32),   # sum sq
        ),
        grid_spec=pltpu.PrefetchScalarGridSpec(
            num_scalar_prefetch=0,
            grid=(N, n_h),
            in_specs=[
                # One padded image per batch element, re-used across the
                # h-tile axis (DMA'd once per n); tap views sliced in-kernel.
                pl.BlockSpec((1, Hp, Wp, C_in), lambda n, i: (n, 0, 0, 0)),
                pl.BlockSpec((n_taps, C_in, C_out), lambda n, i: (0, 0, 0)),
            ],
            out_specs=[
                pl.BlockSpec((1, C_out, tile_hw), lambda n, i: (n, 0, i)),
                pl.BlockSpec((1, 1, 1, C_out), lambda n, i: (n, i, 0, 0)),
                pl.BlockSpec((1, 1, 1, C_out), lambda n, i: (n, i, 0, 0)),
            ],
        ),
        compiler_params=pltpu.CompilerParams(
            dimension_semantics=("parallel", "parallel"),
            vmem_limit_bytes=vmem_limit),
    )
    y, psum, psq = conv_fn(xp, w_taps)

    # BatchNorm2d training-mode statistics (biased variance, eps=1e-5) from
    # the f32 per-tile partial sums (tiny scalar glue).
    # TODO(synk): switch to a shifted-mean/Welford form if E[x^2]-E[x]^2
    # cancellation ever becomes an accuracy issue at large N*H*W.
    count = jnp.float32(N * HW)
    mean = jnp.sum(psum, axis=(0, 1, 2)) / count
    var = jnp.maximum(jnp.sum(psq, axis=(0, 1, 2)) / count - mean * mean, 0.0)
    inv_std = jax.lax.rsqrt(var + eps)
    g = gamma.astype(jnp.float32)
    b = beta.astype(jnp.float32)
    scale = (g * inv_std).reshape(C_out, 1)
    shift = (b - mean * g * inv_std).reshape(C_out, 1)

    bn_fn = pl.pallas_call(
        _bn_relu_kernel,
        out_shape=jax.ShapeDtypeStruct((N, C_out, HW), jnp.float32),
        grid_spec=pltpu.PrefetchScalarGridSpec(
            num_scalar_prefetch=0,
            grid=(N, n_h),
            in_specs=[
                pl.BlockSpec((1, C_out, tile_hw), lambda n, i: (n, 0, i)),
                pl.BlockSpec((C_out, 1), lambda n, i: (0, 0)),
                pl.BlockSpec((C_out, 1), lambda n, i: (0, 0)),
            ],
            out_specs=pl.BlockSpec((1, C_out, tile_hw), lambda n, i: (n, 0, i)),
        ),
        compiler_params=pltpu.CompilerParams(
            dimension_semantics=("parallel", "parallel"),
            vmem_limit_bytes=vmem_limit),
    )
    out = bn_fn(y, scale, shift)

    # Channel-major already -> plain reshape to the module's NCHW output.
    return out.reshape(N, C_out, Ho, Wo)


if __name__ == "__main__":
    key = jax.random.PRNGKey(0)
    N, C_in, H, W = 2, 4, 16, 16
    C_out, ks, stride, padding = 8, 3, 1, 1

    kx, kw = jax.random.split(key)
    x = jax.random.normal(kx, (N, C_in, H, W), dtype=jnp.float32)

    # Deterministic param init mirroring the module's __init__:
    # kaiming_normal_(a=1) -> gain = sqrt(2/(1+1)) = 1, std = 1/sqrt(fan_in)
    fan_in = C_in * ks * ks
    std = 1.0 / float(np.sqrt(fan_in))
    w = jax.random.normal(kw, (C_out, C_in, ks, ks), dtype=jnp.float32) * std
    gamma = jnp.ones((C_out,), jnp.float32)   # BatchNorm2d weight
    beta = jnp.zeros((C_out,), jnp.float32)   # BatchNorm2d bias

    out = conv_bn_relu(x, w, gamma, beta, stride=stride, padding=padding,
                       tile_h=8)   # 2 row-tiles per image -> exercises tiling
    out = jax.block_until_ready(out)

    # Pure-JAX f32 reference for sanity.
    conv_ref = jax.lax.conv_general_dilated(
        x, w, window_strides=(stride, stride),
        padding=((padding, padding), (padding, padding)),
        dimension_numbers=("NCHW", "OIHW", "NCHW"),
        precision=jax.lax.Precision.HIGHEST)
    mean = conv_ref.mean(axis=(0, 2, 3), keepdims=True)
    var = conv_ref.var(axis=(0, 2, 3), keepdims=True)
    bn_ref = (conv_ref - mean) * jax.lax.rsqrt(var + 1e-5)
    bn_ref = bn_ref * gamma.reshape(1, -1, 1, 1) + beta.reshape(1, -1, 1, 1)
    ref = jnp.maximum(bn_ref, 0.0)

    assert out.shape == (N, C_out, H, W), out.shape
    np.testing.assert_allclose(np.asarray(out), np.asarray(ref),
                               atol=2e-2, rtol=2e-2)
    print("KERNEL_OK")
</pallas_src>

<mosaic_0001>
module attributes {stable_mosaic.version = 11 : i64} {
  func.func @_conv_stats_kernel(%arg0: i32, %arg1: i32, %arg2: memref<1x18x18x4xbf16, #tpu.memory_space<vmem>>, %arg3: memref<9x4x8xbf16, #tpu.memory_space<vmem>>, %arg4: memref<1x8x128xbf16, #tpu.memory_space<vmem>>, %arg5: memref<1x1x1x8xf32, #tpu.memory_space<vmem>>, %arg6: memref<1x1x1x8xf32, #tpu.memory_space<vmem>>) attributes {dimension_semantics = [#tpu.dimension_semantics<parallel>, #tpu.dimension_semantics<parallel>], iteration_bounds = array<i64: 2, 2>, scalar_prefetch = 0 : i64, scratch_operands = 0 : i64, tpu.core_type = #tpu.core_type<tc>, window_params = [{transform_indices = @transform_0, window_bounds = array<i64: 1, 18, 18, 4>}, {pipeline_mode = #tpu.pipeline_mode<synchronous>, transform_indices = @transform_1, window_bounds = array<i64: 9, 4, 8>}, {transform_indices = @transform_2, window_bounds = array<i64: 1, 8, 128>}, {transform_indices = @transform_3, window_bounds = array<i64: 1, 1, 1, 8>}, {transform_indices = @transform_4, window_bounds = array<i64: 1, 1, 1, 8>}]} {
    %c8_i32 = arith.constant 8 : i32
    %0 = arith.muli %arg1, %c8_i32 : i32
    %1 = tpu.assume_multiple %0, 8 : i32
    %c1_i32 = arith.constant 1 : i32
    %2 = arith.muli %1, %c1_i32 : i32
    %cst = arith.constant 0.000000e+00 : f32
    %3 = vector.broadcast %cst : f32 to vector<128x8xf32>
    %c0_i32 = arith.constant 0 : i32
    %4 = arith.addi %2, %c0_i32 : i32
    %c0 = arith.constant 0 : index
    %5 = arith.index_cast %4 : i32 to index
    %c0_0 = arith.constant 0 : index
    %c0_1 = arith.constant 0 : index
    %6 = vector.load %arg2[%c0, %5, %c0_0, %c0_1] : memref<1x18x18x4xbf16, #tpu.memory_space<vmem>>, vector<1x8x16x4xbf16>
    %7 = vector.shape_cast %6 : vector<1x8x16x4xbf16> to vector<8x16x4xbf16>
    %8 = vector.shape_cast %7 : vector<8x16x4xbf16> to vector<128x4xbf16>
    %c0_2 = arith.constant 0 : index
    %c0_3 = arith.constant 0 : index
    %c0_4 = arith.constant 0 : index
    %9 = vector.load %arg3[%c0_2, %c0_3, %c0_4] : memref<9x4x8xbf16, #tpu.memory_space<vmem>>, vector<1x4x8xbf16>
    %10 = vector.shape_cast %9 : vector<1x4x8xbf16> to vector<4x8xbf16>
    %cst_5 = arith.constant dense<0.000000e+00> : vector<128x8xf32>
    %11 = tpu.matmul %8, %10, %cst_5 {dimension_numbers = #tpu.dot_dimension_numbers<[1], [0], [0], [1], [0, 0, 1, 1], [], []>} : vector<128x4xbf16>, vector<4x8xbf16>, vector<128x8xf32> -> vector<128x8xf32>
    %12 = arith.addf %3, %11 : vector<128x8xf32>
    %c0_i32_6 = arith.constant 0 : i32
    %13 = arith.addi %2, %c0_i32_6 : i32
    %c0_7 = arith.constant 0 : index
    %14 = arith.index_cast %13 : i32 to index
    %c1 = arith.constant 1 : index
    %c0_8 = arith.constant 0 : index
    %15 = vector.load %arg2[%c0_7, %14, %c1, %c0_8] : memref<1x18x18x4xbf16, #tpu.memory_space<vmem>>, vector<1x8x16x4xbf16>
    %16 = vector.shape_cast %15 : vector<1x8x16x4xbf16> to vector<8x16x4xbf16>
    %17 = vector.shape_cast %16 : vector<8x16x4xbf16> to vector<128x4xbf16>
    %c1_9 = arith.constant 1 : index
    %c0_10 = arith.constant 0 : index
    %c0_11 = arith.constant 0 : index
    %18 = vector.load %arg3[%c1_9, %c0_10, %c0_11] : memref<9x4x8xbf16, #tpu.memory_space<vmem>>, vector<1x4x8xbf16>
    %19 = vector.shape_cast %18 : vector<1x4x8xbf16> to vector<4x8xbf16>
    %cst_12 = arith.constant dense<0.000000e+00> : vector<128x8xf32>
    %20 = tpu.matmul %17, %19, %cst_12 {dimension_numbers = #tpu.dot_dimension_numbers<[1], [0], [0], [1], [0, 0, 1, 1], [], []>} : vector<128x4xbf16>, vector<4x8xbf16>, vector<128x8xf32> -> vector<128x8xf32>
    %21 = arith.addf %12, %20 : vector<128x8xf32>
    %c0_i32_13 = arith.constant 0 : i32
    %22 = arith.addi %2, %c0_i32_13 : i32
    %c0_14 = arith.constant 0 : index
    %23 = arith.index_cast %22 : i32 to index
    %c2 = arith.constant 2 : index
    %c0_15 = arith.constant 0 : index
    %24 = vector.load %arg2[%c0_14, %23, %c2, %c0_15] : memref<1x18x18x4xbf16, #tpu.memory_space<vmem>>, vector<1x8x16x4xbf16>
    %25 = vector.shape_cast %24 : vector<1x8x16x4xbf16> to vector<8x16x4xbf16>
    %26 = vector.shape_cast %25 : vector<8x16x4xbf16> to vector<128x4xbf16>
    %c2_16 = arith.constant 2 : index
    %c0_17 = arith.constant 0 : index
    %c0_18 = arith.constant 0 : index
    %27 = vector.load %arg3[%c2_16, %c0_17, %c0_18] : memref<9x4x8xbf16, #tpu.memory_space<vmem>>, vector<1x4x8xbf16>
    %28 = vector.shape_cast %27 : vector<1x4x8xbf16> to vector<4x8xbf16>
    %cst_19 = arith.constant dense<0.000000e+00> : vector<128x8xf32>
    %29 = tpu.matmul %26, %28, %cst_19 {dimension_numbers = #tpu.dot_dimension_numbers<[1], [0], [0], [1], [0, 0, 1, 1], [], []>} : vector<128x4xbf16>, vector<4x8xbf16>, vector<128x8xf32> -> vector<128x8xf32>
    %30 = arith.addf %21, %29 : vector<128x8xf32>
    %c1_i32_20 = arith.constant 1 : i32
    %31 = arith.addi %2, %c1_i32_20 : i32
    %c0_21 = arith.constant 0 : index
    %32 = arith.index_cast %31 : i32 to index
    %c0_22 = arith.constant 0 : index
    %c0_23 = arith.constant 0 : index
    %33 = vector.load %arg2[%c0_21, %32, %c0_22, %c0_23] : memref<1x18x18x4xbf16, #tpu.memory_space<vmem>>, vector<1x8x16x4xbf16>
    %34 = vector.shape_cast %33 : vector<1x8x16x4xbf16> to vector<8x16x4xbf16>
    %35 = vector.shape_cast %34 : vector<8x16x4xbf16> to vector<128x4xbf16>
    %c3 = arith.constant 3 : index
    %c0_24 = arith.constant 0 : index
    %c0_25 = arith.constant 0 : index
    %36 = vector.load %arg3[%c3, %c0_24, %c0_25] : memref<9x4x8xbf16, #tpu.memory_space<vmem>>, vector<1x4x8xbf16>
    %37 = vector.shape_cast %36 : vector<1x4x8xbf16> to vector<4x8xbf16>
    %cst_26 = arith.constant dense<0.000000e+00> : vector<128x8xf32>
    %38 = tpu.matmul %35, %37, %cst_26 {dimension_numbers = #tpu.dot_dimension_numbers<[1], [0], [0], [1], [0, 0, 1, 1], [], []>} : vector<128x4xbf16>, vector<4x8xbf16>, vector<128x8xf32> -> vector<128x8xf32>
    %39 = arith.addf %30, %38 : vector<128x8xf32>
    %c1_i32_27 = arith.constant 1 : i32
    %40 = arith.addi %2, %c1_i32_27 : i32
    %c0_28 = arith.constant 0 : index
    %41 = arith.index_cast %40 : i32 to index
    %c1_29 = arith.constant 1 : index
    %c0_30 = arith.constant 0 : index
    %42 = vector.load %arg2[%c0_28, %41, %c1_29, %c0_30] : memref<1x18x18x4xbf16, #tpu.memory_space<vmem>>, vector<1x8x16x4xbf16>
    %43 = vector.shape_cast %42 : vector<1x8x16x4xbf16> to vector<8x16x4xbf16>
    %44 = vector.shape_cast %43 : vector<8x16x4xbf16> to vector<128x4xbf16>
    %c4 = arith.constant 4 : index
    %c0_31 = arith.constant 0 : index
    %c0_32 = arith.constant 0 : index
    %45 = vector.load %arg3[%c4, %c0_31, %c0_32] : memref<9x4x8xbf16, #tpu.memory_space<vmem>>, vector<1x4x8xbf16>
    %46 = vector.shape_cast %45 : vector<1x4x8xbf16> to vector<4x8xbf16>
    %cst_33 = arith.constant dense<0.000000e+00> : vector<128x8xf32>
    %47 = tpu.matmul %44, %46, %cst_33 {dimension_numbers = #tpu.dot_dimension_numbers<[1], [0], [0], [1], [0, 0, 1, 1], [], []>} : vector<128x4xbf16>, vector<4x8xbf16>, vector<128x8xf32> -> vector<128x8xf32>
    %48 = arith.addf %39, %47 : vector<128x8xf32>
    %c1_i32_34 = arith.constant 1 : i32
    %49 = arith.addi %2, %c1_i32_34 : i32
    %c0_35 = arith.constant 0 : index
    %50 = arith.index_cast %49 : i32 to index
    %c2_36 = arith.constant 2 : index
    %c0_37 = arith.constant 0 : index
    %51 = vector.load %arg2[%c0_35, %50, %c2_36, %c0_37] : memref<1x18x18x4xbf16, #tpu.memory_space<vmem>>, vector<1x8x16x4xbf16>
    %52 = vector.shape_cast %51 : vector<1x8x16x4xbf16> to vector<8x16x4xbf16>
    %53 = vector.shape_cast %52 : vector<8x16x4xbf16> to vector<128x4xbf16>
    %c5 = arith.constant 5 : index
    %c0_38 = arith.constant 0 : index
    %c0_39 = arith.constant 0 : index
    %54 = vector.load %arg3[%c5, %c0_38, %c0_39] : memref<9x4x8xbf16, #tpu.memory_space<vmem>>, vector<1x4x8xbf16>
    %55 = vector.shape_cast %54 : vector<1x4x8xbf16> to vector<4x8xbf16>
    %cst_40 = arith.constant dense<0.000000e+00> : vector<128x8xf32>
    %56 = tpu.matmul %53, %55, %cst_40 {dimension_numbers = #tpu.dot_dimension_numbers<[1], [0], [0], [1], [0, 0, 1, 1], [], []>} : vector<128x4xbf16>, vector<4x8xbf16>, vector<128x8xf32> -> vector<128x8xf32>
    %57 = arith.addf %48, %56 : vector<128x8xf32>
    %c2_i32 = arith.constant 2 : i32
    %58 = arith.addi %2, %c2_i32 : i32
    %c0_41 = arith.constant 0 : index
    %59 = arith.index_cast %58 : i32 to index
    %c0_42 = arith.constant 0 : index
    %c0_43 = arith.constant 0 : index
    %60 = vector.load %arg2[%c0_41, %59, %c0_42, %c0_43] : memref<1x18x18x4xbf16, #tpu.memory_space<vmem>>, vector<1x8x16x4xbf16>
    %61 = vector.shape_cast %60 : vector<1x8x16x4xbf16> to vector<8x16x4xbf16>
    %62 = vector.shape_cast %61 : vector<8x16x4xbf16> to vector<128x4xbf16>
    %c6 = arith.constant 6 : index
    %c0_44 = arith.constant 0 : index
    %c0_45 = arith.constant 0 : index
    %63 = vector.load %arg3[%c6, %c0_44, %c0_45] : memref<9x4x8xbf16, #tpu.memory_space<vmem>>, vector<1x4x8xbf16>
    %64 = vector.shape_cast %63 : vector<1x4x8xbf16> to vector<4x8xbf16>
    %cst_46 = arith.constant dense<0.000000e+00> : vector<128x8xf32>
    %65 = tpu.matmul %62, %64, %cst_46 {dimension_numbers = #tpu.dot_dimension_numbers<[1], [0], [0], [1], [0, 0, 1, 1], [], []>} : vector<128x4xbf16>, vector<4x8xbf16>, vector<128x8xf32> -> vector<128x8xf32>
    %66 = arith.addf %57, %65 : vector<128x8xf32>
    %c2_i32_47 = arith.constant 2 : i32
    %67 = arith.addi %2, %c2_i32_47 : i32
    %c0_48 = arith.constant 0 : index
    %68 = arith.index_cast %67 : i32 to index
    %c1_49 = arith.constant 1 : index
    %c0_50 = arith.constant 0 : index
    %69 = vector.load %arg2[%c0_48, %68, %c1_49, %c0_50] : memref<1x18x18x4xbf16, #tpu.memory_space<vmem>>, vector<1x8x16x4xbf16>
    %70 = vector.shape_cast %69 : vector<1x8x16x4xbf16> to vector<8x16x4xbf16>
    %71 = vector.shape_cast %70 : vector<8x16x4xbf16> to vector<128x4xbf16>
    %c7 = arith.constant 7 : index
    %c0_51 = arith.constant 0 : index
    %c0_52 = arith.constant 0 : index
    %72 = vector.load %arg3[%c7, %c0_51, %c0_52] : memref<9x4x8xbf16, #tpu.memory_space<vmem>>, vector<1x4x8xbf16>
    %73 = vector.shape_cast %72 : vector<1x4x8xbf16> to vector<4x8xbf16>
    %cst_53 = arith.constant dense<0.000000e+00> : vector<128x8xf32>
    %74 = tpu.matmul %71, %73, %cst_53 {dimension_numbers = #tpu.dot_dimension_numbers<[1], [0], [0], [1], [0, 0, 1, 1], [], []>} : vector<128x4xbf16>, vector<4x8xbf16>, vector<128x8xf32> -> vector<128x8xf32>
    %75 = arith.addf %66, %74 : vector<128x8xf32>
    %c2_i32_54 = arith.constant 2 : i32
    %76 = arith.addi %2, %c2_i32_54 : i32
    %c0_55 = arith.constant 0 : index
    %77 = arith.index_cast %76 : i32 to index
    %c2_56 = arith.constant 2 : index
    %c0_57 = arith.constant 0 : index
    %78 = vector.load %arg2[%c0_55, %77, %c2_56, %c0_57] : memref<1x18x18x4xbf16, #tpu.memory_space<vmem>>, vector<1x8x16x4xbf16>
    %79 = vector.shape_cast %78 : vector<1x8x16x4xbf16> to vector<8x16x4xbf16>
    %80 = vector.shape_cast %79 : vector<8x16x4xbf16> to vector<128x4xbf16>
    %c8 = arith.constant 8 : index
    %c0_58 = arith.constant 0 : index
    %c0_59 = arith.constant 0 : index
    %81 = vector.load %arg3[%c8, %c0_58, %c0_59] : memref<9x4x8xbf16, #tpu.memory_space<vmem>>, vector<1x4x8xbf16>
    %82 = vector.shape_cast %81 : vector<1x4x8xbf16> to vector<4x8xbf16>
    %cst_60 = arith.constant dense<0.000000e+00> : vector<128x8xf32>
    %83 = tpu.matmul %80, %82, %cst_60 {dimension_numbers = #tpu.dot_dimension_numbers<[1], [0], [0], [1], [0, 0, 1, 1], [], []>} : vector<128x4xbf16>, vector<4x8xbf16>, vector<128x8xf32> -> vector<128x8xf32>
    %84 = arith.addf %75, %83 : vector<128x8xf32>
    %cst_61 = arith.constant dense<0.000000e+00> : vector<8xf32>
    %85 = vector.multi_reduction <add>, %84, %cst_61 [0] : vector<128x8xf32> to vector<8xf32>
    %86 = vector.shape_cast %85 : vector<8xf32> to vector<1x8xf32>
    %c0_62 = arith.constant 0 : index
    %c0_63 = arith.constant 0 : index
    %c0_64 = arith.constant 0 : index
    %c0_65 = arith.constant 0 : index
    %87 = vector.load %arg5[%c0_62, %c0_63, %c0_64, %c0_65] : memref<1x1x1x8xf32, #tpu.memory_space<vmem>>, vector<1x1x1x8xf32>
    %88 = vector.shape_cast %87 : vector<1x1x1x8xf32> to vector<1x8xf32>
    %89 = vector.shape_cast %86 : vector<1x8xf32> to vector<1x1x1x8xf32>
    tpu.vector_store %arg5[%c0_62, %c0_63, %c0_64, %c0_65], %89 {strides = array<i32>} : memref<1x1x1x8xf32, #tpu.memory_space<vmem>>, vector<1x1x1x8xf32>,
    %90 = arith.mulf %84, %84 : vector<128x8xf32>
    %cst_66 = arith.constant dense<0.000000e+00> : vector<8xf32>
    %91 = vector.multi_reduction <add>, %90, %cst_66 [0] : vector<128x8xf32> to vector<8xf32>
    %92 = vector.shape_cast %91 : vector<8xf32> to vector<1x8xf32>
    %c0_67 = arith.constant 0 : index
    %c0_68 = arith.constant 0 : index
    %c0_69 = arith.constant 0 : index
    %c0_70 = arith.constant 0 : index
    %93 = vector.load %arg6[%c0_67, %c0_68, %c0_69, %c0_70] : memref<1x1x1x8xf32, #tpu.memory_space<vmem>>, vector<1x1x1x8xf32>
    %94 = vector.shape_cast %93 : vector<1x1x1x8xf32> to vector<1x8xf32>
    %95 = vector.shape_cast %92 : vector<1x8xf32> to vector<1x1x1x8xf32>
    tpu.vector_store %arg6[%c0_67, %c0_68, %c0_69, %c0_70], %95 {strides = array<i32>} : memref<1x1x1x8xf32, #tpu.memory_space<vmem>>, vector<1x1x1x8xf32>,
    %96 = tpu.transpose %84, [1, 0] : vector<128x8xf32> -> vector<8x128xf32>
    %97 = arith.truncf %96 : vector<8x128xf32> to vector<8x128xbf16>
    %c0_71 = arith.constant 0 : index
    %c0_72 = arith.constant 0 : index
    %c0_73 = arith.constant 0 : index
    %98 = vector.load %arg4[%c0_71, %c0_72, %c0_73] : memref<1x8x128xbf16, #tpu.memory_space<vmem>>, vector<1x8x128xbf16>
    %99 = vector.shape_cast %98 : vector<1x8x128xbf16> to vector<8x128xbf16>
    %100 = vector.shape_cast %97 : vector<8x128xbf16> to vector<1x8x128xbf16>
    tpu.vector_store %arg4[%c0_71, %c0_72, %c0_73], %100 {strides = array<i32>} : memref<1x8x128xbf16, #tpu.memory_space<vmem>>, vector<1x8x128xbf16>,
    return
  }
  func.func @transform_0(%arg0: i32, %arg1: i32) -> (i32, i32, i32, i32) {
    %c0_i32 = arith.constant 0 : i32
    %c0_i32_0 = arith.constant 0 : i32
    %c0_i32_1 = arith.constant 0 : i32
    %c0_i32_2 = arith.constant 0 : i32
    return %arg0, %c0_i32, %c0_i32_0, %c0_i32_1 : i32, i32, i32, i32
  }
  func.func @transform_1(%arg0: i32, %arg1: i32) -> (i32, i32, i32) {
    %c0_i32 = arith.constant 0 : i32
    %c0_i32_0 = arith.constant 0 : i32
    %c0_i32_1 = arith.constant 0 : i32
    %c0_i32_2 = arith.constant 0 : i32
    return %c0_i32, %c0_i32_0, %c0_i32_1 : i32, i32, i32
  }
  func.func @transform_2(%arg0: i32, %arg1: i32) -> (i32, i32, i32) {
    %c0_i32 = arith.constant 0 : i32
    %c0_i32_0 = arith.constant 0 : i32
    return %arg0, %c0_i32, %arg1 : i32, i32, i32
  }
  func.func @transform_3(%arg0: i32, %arg1: i32) -> (i32, i32, i32, i32) {
    %c0_i32 = arith.constant 0 : i32
    %c0_i32_0 = arith.constant 0 : i32
    %c0_i32_1 = arith.constant 0 : i32
    return %arg0, %arg1, %c0_i32, %c0_i32_0 : i32, i32, i32, i32
  }
  func.func @transform_4(%arg0: i32, %arg1: i32) -> (i32, i32, i32, i32) {
    %c0_i32 = arith.constant 0 : i32
    %c0_i32_0 = arith.constant 0 : i32
    %c0_i32_1 = arith.constant 0 : i32
    return %arg0, %arg1, %c0_i32, %c0_i32_0 : i32, i32, i32, i32
  }
}

</mosaic_0001>

<bundles_post_ra>
// kernel: tpu_custom_call.1
= control target key start
LH: loop header
LB: loop body
LE: loop exit
PB: predicated region body
PF: predicated region fallthrough
CT: control target
= control target key end

     0   :  { %s5153_s0 = inlined_call_operand.vmem [shape: bf16[2,18,18,4], index: 0, kind: input, shape index: {}]   ;;  %s5154_s1 = inlined_call_operand.vmem [shape: bf16[9,4,8], index: 1, kind: input, shape index: {}]   ;;  %s5155_s2 = inlined_call_operand.hbm [shape: bf16[2,8,256], index: 2, kind: output, shape index: {0}]   ;;  %s5156_s3 = inlined_call_operand.hbm [shape: f32[2,2,1,8], index: 3, kind: output, shape index: {1}]   ;;  %s5157_s4 = inlined_call_operand.hbm [shape: f32[2,2,1,8], index: 4, kind: output, shape index: {2}]  }
   0x1   :  { %5165 = sst [smem:[#allocation13_spill]] %s5153_s0 }
   0x2   :  { %10 = vsyncpa [#allocation3], 0 }
   0x3   :  { %12 = vsyncpa [#allocation3 + $0x1], 0 }
   0x4   :  { %13 = vsyncpa [#allocation5], 0 }
   0x5   :  { %15 = vsyncpa [#allocation5 + $0x1], 0  ;;  %s3987_s15 = smov 0   ;;  %s3989_s16 = smov 0  }
   0x6   :  { %s3991_s17 = smov 0   ;;  %s3993_s18 = smov 0  }
   0x7   :  { %s3995_s19 = smov 0   ;;  %s3997_s20 = smov 0  }
   0x8   :  { %s3999_s21 = smov 0   ;;  %s4001_s22 = smov 0  }
   0x9 LB: > { %s3017_s23 = sadd.s32 4294967295, %s3957_s22   ;;  %s5163_s24 = sadd.s32 4294967294, %s3957_s22   ;;  %s3957_s22 = sphi %s4001_s22, %s21_s22   ;;  %s3953_s21 = sphi %s3999_s21, %s5194_s21   ;;  %s3949_s20 = sphi %s3997_s20, %s5193_s20   ;;  %s3945_s19 = sphi %s3995_s19, %s5192_s19   ;;  %s3941_s18 = sphi %s3993_s18, %s5191_s18   ;;  %s3937_s17 = sphi %s3991_s17, %s5190_s17   ;;  %s3933_s16 = sphi %s3989_s16, %s5189_s16   ;;  %s3929_s15 = sphi %s3987_s15, %s5188_s15  }
   0xa   : > { %s30_s25 = sadd.s32 1, %s3949_s20  ;;  %s33_s26 = sadd.s32 1, %s3953_s21 }
   0xb   : > { %p31_p0 = scmp.ge.s32.totalorder %s30_s25, 2  ;;  %p99_p1 = scmp.ne.s32.totalorder %s3937_s17, %s3933_s16 }
   0xc   : > { %p100_p2 = scmp.eq.s32.totalorder %s3017_s23, 3  ;;  %p105_p5 = scmp.ne.s32.totalorder %s3933_s16, %s3929_s15 }
   0xd   : > { %s5196_s25 = smov (%p31_p0, %s30_s25), 0  ;;  %s5198_s26 = smov (!%p31_p0, %s33_s26), %s3953_s21 }
   0xe   : > { %s85_s27 = ssub.s32 %s3949_s20, %s5196_s25  ;;  %p4040_p3 = por %p100_p2, %p99_p1 }
   0xf   : > { %p35_p4 = scmp.ge.s32.totalorder %s5198_s26, 2  ;;  %p106_p6 = scmp.eq.s32.totalorder %s5163_s24, 3 }
  0x10   : > { %p3021_p7 = scmp.ge.s32.totalorder %s3957_s22, 1  ;;  %p191_p9 = scmp.lt.s32.totalorder %s3957_s22, 5 }
  0x11   : > { %s5200_s26 = smov (%p35_p4, %s5198_s26), 0  ;;  %p4051_p8 = por %p106_p6, %p105_p5 }
  0x12   : > { %s84_s30 = ssub.s32 %s3953_s21, %s5200_s26  ;;  %s89_s5 = sadd.s32 1, %s3937_s17 }
  0x13   : > { %s86_s6 = sor.u32 %s85_s27, %s84_s30  ;;  %p192_p10 = pnand %p3021_p7, %p191_p9 }
  0x14   : > { %p87_p11 = scmp.eq.s32.totalorder %s86_s6, 0 }
  0x15   : > { %195 = sbr.rel (%p192_p10) target bundleno = 578 (0x242), region = 28 }
  0x16   : > { %s4060_s7 = scalar_select %p87_p11, %s3937_s17, %s89_s5  }
  0x1c   : > { %vm506_vm0 = vcmask 1041408   ;;  %v3144_v0 = vld [vmem:[%s5154_s1 + $0x8] sm:$0x3]  ;;  %v3027_v1 = vld [vmem:[%s5154_s1 + $0x2] sm:$0x3]  ;;  %p225_p12 = scmp.lt.s32.totalorder %s3945_s19, 1 }
  0x1d   : > { %3690 = vmatprep.subr.msk.bf16.mxu0 %vm506_vm0, %v3144_v0  ;;  %3686 = vmatprep.subr.msk.bf16.mxu1 %vm506_vm0, %v3027_v1  ;;  %v4072_v2 = vsel %vm506_vm0, %v3144_v0, 0  ;;  %v508_v3 = vsel %vm506_vm0, %v3027_v1, 0  ;;  %v3177_v4 = vld [vmem:[%s5154_s1 + $0xa] sm:$0x3]  ;;  %s3312_s27 = smul.u32 96, %s3941_s18  ;;  %s5168_s0 = sld [smem:[#allocation13_spill]] }
  0x1e   : > { %3467 = vmatpush3.bf16.msra.mxu0 %v4072_v2  ;;  %3395 = vmatpush3.bf16.msra.mxu1 %v508_v3  ;;  %s226_s12 = scalar_select %p225_p12, %s3945_s19, 1  ;;  %v251_v5 = vld [vmem:[%s5154_s1] sm:$0x3]  ;;  %vm260_vm1 = vsmask.f32 3328  ;;  %vm481_vm3 = vcmask 31744  }
  0x1f   : > { %3692 = vmatprep.subr.msk.bf16.mxu0 %vm506_vm0, %v3177_v4  ;;  %3687 = vmatprep.subr.msk.bf16.mxu1 %vm506_vm0, %v251_v5  ;;  %vm261_vm2 = vsmask.f32 7440  ;;  %v4113_v17 = vsel %vm506_vm0, %v3177_v4, 0  ;;  %v4119_v26 = vld [vmem:[%s5154_s1 + $0xc] sm:$0x3]  ;;  %v4136_v37 = vsel %vm506_vm0, %v251_v5, 0 }
  0x20   : > { %s3696_s6 = smul.u32 216, %s226_s12  ;;  %vm4128_vm4 = vmor %vm260_vm1, %vm261_vm2  ;;  %v4140_v41 = vsel %vm506_vm0, %v4119_v26, 0  ;;  %vm795_vm5 = vcmask 1042432   ;;  %vm796_vm6 = vcmask 1046532   ;;  %vm2696_vm8 = vcmask 64512   ;;  %s5007_s14 = sand.u32 1, %s3933_s16  }
  0x21   : > { %vm4283_vm7 = vmor %vm795_vm5, %vm796_vm6  ;;  %s5015_s30 = sand.u32 1, %s3017_s23   ;;  %s218_s5 = scalar_lea.vmem [#allocation4], %s5007_s14  ;;  %vm2734_vm9 = vcmask 57344  }
  0x22   : > { %s5164_s8 = scalar_lea.vmem [#allocation6], %s5007_s14  ;;  %s2830_s24 = scalar_lea.sflag [#allocation5], %s5015_s30 }
  0x23   : > { %s229_s10 = scalar_lea.vmem %s5168_s0, %s3696_s6  ;;  %s2863_s6 = sshll.u32 %s218_s5, 4  ;;  %s5028_s6 = int_to_ptr.vmem [resolvable:$true] %s2863_s6 }
  0x24   : > { %s4089_s11 = scalar_lea.vmem %s229_s10, %s3312_s27  ;;  %s3959_s9 = smov [#allocation4]  }
  0x25   : > { %v4092_v6 = vld [vmem:[%s4089_s11] sm:$0xf]  ;;  %v4095_v7 = vld [vmem:[%s4089_s11 + $0x4] sm:$0xf]  ;;  %v4098_v8 = vld [vmem:[%s4089_s11 + $0x8] sm:$0x1] }
  0x26   : > { %v264_v9 = vshrl.u32 %v4092_v6, 16  ;;  %v267_v10 = vshll.u32 %v4092_v6, 16  ;;  %v273_v11 = vshll.u32 %v4095_v7, 16  ;;  %v277_v12 = vshrl.u32 %v4095_v7, 16  ;;  %v3120_v13 = vld [vmem:[%s4089_s11 + $0xc] sm:$0xf] }
  0x27   : > { %v283_v14 = vshll.u32 %v4098_v8, 16  ;;  %v4107_v15 = vld [vmem:[%s4089_s11 + $0x10] sm:$0xf]  ;;  %v4110_v16 = vld [vmem:[%s4089_s11 + $0x14] sm:$0x1]  ;;  %v1247_v23 = vshrl.u32 %v3120_v13, 16 }
  0x28   : > { %v266_v18 = vrot.slane %v264_v9, 4  ;;  %v269_v19 = vrot.slane %v267_v10, 5  ;;  %v275_v20 = vrot.slane %v273_v11, 5  ;;  %v279_v21 = vrot.slane %v277_v12, 4  ;;  %v4124_v31 = vld [vmem:[%s4089_s11 + $0xc] sm:$0xf] }
  0x29   : > { %v285_v22 = vrot.slane %v283_v14, 5  ;;  %v1250_v24 = vshll.u32 %v3120_v13, 16  ;;  %v1256_v25 = vshll.u32 %v4107_v15, 16  ;;  %v1260_v29 = vshrl.u32 %v4107_v15, 16  ;;  %v4133_v36 = vld [vmem:[%s4089_s11 + $0x10] sm:$0xf] }
  0x2a   : > { %v270_v27 = vor.u32 %v269_v19, %v266_v18  ;;  %v280_v28 = vor.u32 %v279_v21, %v275_v20  ;;  %v1266_v30 = vshll.u32 %v4110_v16, 16  ;;  %v1249_v33 = vrot.slane %v1247_v23, 4  ;;  %v4143_v44 = vld [vmem:[%s4089_s11 + $0x14] sm:$0x1]  ;;  %v3123_v55 = vld [vmem:[%s4089_s11 + $0x18] sm:$0xf] }
  0x2b   : > { %v1252_v34 = vrot.slane %v1250_v24, 5  ;;  %v1258_v35 = vrot.slane %v1256_v25, 5  ;;  %v1262_v40 = vrot.slane %v1260_v29, 4  ;;  %v288_v45 = vshrl.u32 %v4124_v31, 16  ;;  %v4156_v60 = vld [vmem:[%s4089_s11 + $0x1c] sm:$0xf] }
  0x2c   : > { %v271_v38 = vrot.slane %v270_v27, 4  ;;  %v281_v39 = vrot.slane %v280_v28, 4  ;;  %v1268_v43 = vrot.slane %v1266_v30, 5  ;;  %v291_v46 = vshll.u32 %v4124_v31, 16  ;;  %v4164_v1 = vld [vmem:[%s4089_s11 + $0x20] sm:$0x1] }
  0x2d   : > { %v1253_v42 = vor.u32 %v1252_v34, %v1249_v33  ;;  %v1263_v49 = vor.u32 %v1262_v40, %v1258_v35  ;;  %v297_v50 = vshll.u32 %v4133_v36, 16  ;;  %v290_v53 = vrot.slane %v288_v45, 4  ;;  %v4172_v21 = vld [vmem:[%s4089_s11 + $0x18] sm:$0xf]  ;;  %v4179_v27 = vld [vmem:[%s4089_s11 + $0x1c] sm:$0xf] }
  0x2e   : > { %v276_v47 = vsel %vm4128_vm4, %v271_v38, %v275_v20  ;;  %v286_v48 = vsel %vm4128_vm4, %v281_v39, %v285_v22  ;;  %v293_v54 = vrot.slane %v291_v46, 5  ;;  %v301_v58 = vshrl.u32 %v4133_v36, 16  ;;  %v4187_v38 = vld [vmem:[%s4089_s11 + $0x20] sm:$0x1]  ;;  %s3807_s10 = sshll.u32 %s3959_s9, 4  ;;  %s3808_s10 = int_to_ptr.vmem [resolvable:$false] %s3807_s10 }
  0x2f   : > { %v3028_v51 = vcombine.low %v276_v47, %v286_v48  ;;  %v1254_v52 = vrot.slane %v1253_v42, 4  ;;  %v1264_v56 = vrot.slane %v1263_v49, 4  ;;  %v299_v57 = vrot.slane %v297_v50, 5  ;;  %v3126_v47 = vld [vmem:[%s4089_s11 + $0x24] sm:$0xf]  ;;  %s3809_s0 = scalar_lea.vmem %s3808_s10, 32  ;;  %p3810_p2 = scmp.lt.s32.totalorder %s5028_s6, %s3808_s10 }
  0x30   : > { %v307_v59 = vshll.u32 %v4143_v44, 16  ;;  %v1638_v62 = vrot.slane %v4107_v15, 5  ;;  %v1641_v63 = vrot.slane %v4110_v16, 5  ;;  %v294_v0 = vor.u32 %v293_v54, %v290_v53 }
  0x31   : > { %3396 = vmatprep.mubr.msk.bf16.mxu1 %vm481_vm3, %v3028_v51  ;;  %v1259_v61 = vsel %vm4128_vm4, %v1254_v52, %v1258_v35  ;;  %v1269_v3 = vsel %vm4128_vm4, %v1264_v56, %v1268_v43  ;;  %v303_v4 = vrot.slane %v301_v58, 4  ;;  %v1271_v9 = vshrl.u32 %v3123_v55, 16  ;;  %v4197_v52 = vld [vmem:[%s4089_s11 + $0x28] sm:$0xf] }
  0x32   : > { %v309_v5 = vrot.slane %v307_v59, 5  ;;  %v3145_v10 = vcombine.low %v1259_v61, %v1269_v3  ;;  %v295_v11 = vrot.slane %v294_v0, 4  ;;  %v1274_v12 = vshll.u32 %v3123_v55, 16  ;;  %v4209_v61 = vld [vmem:[%s4089_s11 + $0x2c] sm:$0x1] }
  0x33   : > { %v1280_v13 = vshll.u32 %v4156_v60, 16  ;;  %v304_v14 = vor.u32 %v303_v4, %v299_v57  ;;  %v1273_v18 = vrot.slane %v1271_v9, 4  ;;  %v1284_v19 = vshrl.u32 %v4156_v60, 16 }
  0x34   : > { %v1290_v20 = vshll.u32 %v4164_v1, 16  ;;  %3468 = vmatprep.mubr.msk.bf16.mxu0 %vm481_vm3, %v3145_v10  ;;  %v300_v22 = vsel %vm4128_vm4, %v295_v11, %v299_v57  ;;  %v1276_v23 = vrot.slane %v1274_v12, 5  ;;  %v1645_v25 = vrot.slane %v4156_v60, 5  ;;  %v4203_v57 = vld [vmem:[%s5154_s1 + $0x4] sm:$0x3] }
  0x35   : > { %v1282_v24 = vrot.slane %v1280_v13, 5  ;;  %v305_v28 = vrot.slane %v304_v14, 4  ;;  %v1286_v29 = vrot.slane %v1284_v19, 4  ;;  %v1648_v33 = vrot.slane %v4164_v1, 5  ;;  %v4215_v11 = vld [vmem:[%s4089_s11 + $0x24] sm:$0xf] }
  0x36   : > { %v1292_v30 = vrot.slane %v1290_v20, 5  ;;  %v1277_v34 = vor.u32 %v1276_v23, %v1273_v18  ;;  %v4184_v35 = vrot.slane %v1645_v25, 4  ;;  %v312_v39 = vshrl.u32 %v4172_v21, 16  ;;  %v4219_v19 = vld [vmem:[%s4089_s11 + $0x28] sm:$0xf] }
  0x37   : > { %v315_v40 = vshll.u32 %v4172_v21, 16  ;;  %v310_v42 = vsel %vm4128_vm4, %v305_v28, %v309_v5  ;;  %v1287_v43 = vor.u32 %v1286_v29, %v1282_v24  ;;  %v321_v45 = vshll.u32 %v4179_v27, 16  ;;  %v4229_v29 = vld [vmem:[%s4089_s11 + $0x2c] sm:$0x1] }
  0x38   : > { %v325_v46 = vshrl.u32 %v4179_v27, 16  ;;  %v3029_v48 = vcombine.low %v300_v22, %v310_v42  ;;  %v1278_v49 = vrot.slane %v1277_v34, 4  ;;  %v314_v50 = vrot.slane %v312_v39, 4 }
  0x39   : > { %v317_v51 = vrot.slane %v315_v40, 5  ;;  %v1288_v53 = vrot.slane %v1287_v43, 4  ;;  %v323_v54 = vrot.slane %v321_v45, 5  ;;  %v331_v56 = vshll.u32 %v4187_v38, 16  ;;  %v3129_v45 = vld [vmem:[%s4089_s11 + $0x30] sm:$0xf] }
  0x3a   : > { %v327_v55 = vrot.slane %v325_v46, 4  ;;  %3397 = vmatmul.mubr.msk.bf16.vlgmr.msra.gmra.mrb[0].mxu1 %vm481_vm3, %v3029_v48  ;;  %v1283_v58 = vsel %vm4128_vm4, %v1278_v49, %v1282_v24  ;;  %v1295_v0 = vshrl.u32 %v3126_v47, 16  ;;  %v1298_v3 = vshll.u32 %v3126_v47, 16 }
  0x3b   : > { %v318_v59 = vor.u32 %v317_v51, %v314_v50  ;;  %v1293_v4 = vsel %vm4128_vm4, %v1288_v53, %v1292_v30  ;;  %v333_v9 = vrot.slane %v331_v56, 5  ;;  %v1304_v10 = vshll.u32 %v4197_v52, 16  ;;  %3413 = vmatpush3.bf16.msra.mxu1 %v4136_v37  ;;  %v4239_v50 = vld [vmem:[%s4089_s11 + $0x34] sm:$0xf] }
  0x3c   : > { %v328_v5 = vor.u32 %v327_v55, %v323_v54  ;;  %v3146_v12 = vcombine.low %v1283_v58, %v1293_v4  ;;  %v1297_v14 = vrot.slane %v1295_v0, 4  ;;  %v1300_v18 = vrot.slane %v1298_v3, 5  ;;  %3688 = vmatprep.subr.msk.bf16.mxu1 %vm506_vm0, %v4203_v57  ;;  %v4249_v58 = vld [vmem:[%s4089_s11 + $0x38] sm:$0x1] }
  0x3d   : > { %v319_v13 = vrot.slane %v318_v59, 4  ;;  %v1306_v22 = vrot.slane %v1304_v10, 5  ;;  %v1308_v23 = vshrl.u32 %v4197_v52, 16  ;;  %v1314_v24 = vshll.u32 %v4209_v61, 16 }
  0x3e   : > { %v329_v20 = vrot.slane %v328_v5, 4  ;;  %3469 = vmatmul.mubr.msk.bf16.vlgmr.msra.gmra.mrb[0].mxu0 %vm481_vm3, %v3146_v12  ;;  %v1301_v28 = vor.u32 %v1300_v18, %v1297_v14  ;;  %v336_v30 = vshrl.u32 %v4215_v11, 16  ;;  %v339_v34 = vshll.u32 %v4215_v11, 16  ;;  %v4254_v14 = vld [vmem:[%s4089_s11 + $0x30] sm:$0xf] }
  0x3f   : > { %v324_v37 = vsel %vm4128_vm4, %v319_v13, %v323_v54  ;;  %3485 = vmatpush3.bf16.msra.mxu0 %v4113_v17  ;;  %v1310_v40 = vrot.slane %v1308_v23, 4  ;;  %v1316_v42 = vrot.slane %v1314_v24, 5  ;;  %v345_v43 = vshll.u32 %v4219_v19, 16  ;;  %v4260_v24 = vld [vmem:[%s4089_s11 + $0x34] sm:$0xf] }
  0x40   : > { %v334_v39 = vsel %vm4128_vm4, %v329_v20, %v333_v9  ;;  %v1302_v47 = vrot.slane %v1301_v28, 4  ;;  %v338_v48 = vrot.slane %v336_v30, 4  ;;  %v341_v49 = vrot.slane %v339_v34, 5  ;;  %3693 = vmatprep.subr.msk.bf16.mxu0 %vm506_vm0, %v4119_v26 }
  0x41   : > { %v3030_v46 = vcombine.low %v324_v37, %v334_v39  ;;  %v1311_v17 = vor.u32 %v1310_v40, %v1306_v22  ;;  %v347_v51 = vrot.slane %v345_v43, 5  ;;  %v349_v53 = vshrl.u32 %v4219_v19, 16  ;;  %v4265_v39 = vld [vmem:[%s4089_s11 + $0x38] sm:$0x1] }
  0x42   : > { %v355_v54 = vshll.u32 %v4229_v29, 16  ;;  %v1307_v55 = vsel %vm4128_vm4, %v1302_v47, %v1306_v22  ;;  %v342_v56 = vor.u32 %v341_v49, %v338_v48  ;;  %v1319_v59 = vshrl.u32 %v3129_v45, 16 }
  0x43   : > { %3400 = vmatprep.mubr.msk.bf16.mxu1 %vm481_vm3, %v3030_v46  ;;  %v1322_v0 = vshll.u32 %v3129_v45, 16  ;;  %v1312_v3 = vrot.slane %v1311_v17, 4  ;;  %v351_v26 = vrot.slane %v349_v53, 4  ;;  %v1328_v5 = vshll.u32 %v4239_v50, 16  ;;  %v3161_v17 = vld [vmem:[%s4089_s11 + $0xc] sm:$0xe] }
  0x44   : > { %v357_v4 = vrot.slane %v355_v54, 5  ;;  %v343_v9 = vrot.slane %v342_v56, 4  ;;  %v1321_v10 = vrot.slane %v1319_v59, 4  ;;  %v1332_v13 = vshrl.u32 %v4239_v50, 16  ;;  %v4277_v56 = vld [vmem:[%s4089_s11 + $0x3c] sm:$0xf] }
  0x45   : > { %v1324_v12 = vrot.slane %v1322_v0, 5  ;;  %v1317_v18 = vsel %vm4128_vm4, %v1312_v3, %v1316_v42  ;;  %v352_v20 = vor.u32 %v351_v26, %v347_v51  ;;  %v1330_v22 = vrot.slane %v1328_v5, 5 }
  0x46   : > { %v1338_v23 = vshll.u32 %v4249_v58, 16  ;;  %v3147_v37 = vcombine.low %v1307_v55, %v1317_v18  ;;  %v348_v28 = vsel %vm4128_vm4, %v343_v9, %v347_v51  ;;  %v1334_v34 = vrot.slane %v1332_v13, 4  ;;  %v4291_v18 = vld [vmem:[%s4089_s11 + $0x44] sm:$0x1] }
  0x47   : > { %v1325_v30 = vor.u32 %v1324_v12, %v1321_v10  ;;  %v353_v40 = vrot.slane %v352_v20, 4  ;;  %v360_v42 = vshrl.u32 %v4254_v14, 16  ;;  %v363_v45 = vshll.u32 %v4254_v14, 16  ;;  %v3162_v20 = vld [vmem:[%s4089_s11 + $0x18] sm:$0xe] }
  0x48   : > { %v1340_v43 = vrot.slane %v1338_v23, 5  ;;  %3472 = vmatprep.mubr.msk.bf16.mxu0 %vm481_vm3, %v3147_v37  ;;  %v1335_v47 = vor.u32 %v1334_v34, %v1330_v22  ;;  %v369_v48 = vshll.u32 %v4260_v24, 16  ;;  %v373_v49 = vshrl.u32 %v4260_v24, 16 }
  0x49   : > { %v1326_v46 = vrot.slane %v1325_v30, 4  ;;  %v358_v51 = vsel %vm4128_vm4, %v353_v40, %v357_v4  ;;  %v362_v53 = vrot.slane %v360_v42, 4  ;;  %v365_v54 = vrot.slane %v363_v45, 5  ;;  %v4288_v4 = vld [vmem:[%s4089_s11 + $0x40] sm:$0xf] }
  0x4a   : > { %v379_v55 = vshll.u32 %v4265_v39, 16  ;;  %v3031_v59 = vcombine.low %v348_v28, %v358_v51  ;;  %v1336_v3 = vrot.slane %v1335_v47, 4  ;;  %v371_v26 = vrot.slane %v369_v48, 5  ;;  %v4302_v30 = vld [vmem:[%s4089_s11 + $0x48] sm:$0xf] }
  0x4b   : > { %v1331_v0 = vsel %vm4128_vm4, %v1326_v46, %v1330_v22  ;;  %v366_v9 = vor.u32 %v365_v54, %v362_v53  ;;  %v375_v10 = vrot.slane %v373_v49, 4  ;;  %v3169_v13 = vrot.slane %v3161_v17, 9 }
  0x4c   : > { %v381_v12 = vrot.slane %v379_v55, 5  ;;  %3401 = vmatmul.mubr.msk.bf16.gmra.mrb[4].mxu1 %vm481_vm3, %v3031_v59  ;;  %v1341_v22 = vsel %vm4128_vm4, %v1336_v3, %v1340_v43  ;;  %v1640_v23 = vrot.slane %v1638_v62, 4  ;;  %v384_v37 = vshrl.u32 %v4277_v56, 16  ;;  %v4322_v55 = vld [vmem:[%s4089_s11 + $0x50] sm:$0x1] }
  0x4d   : > { %v387_v28 = vshll.u32 %v4277_v56, 16  ;;  %v3148_v34 = vcombine.low %v1331_v0, %v1341_v22  ;;  %v367_v40 = vrot.slane %v366_v9, 4  ;;  %v376_v42 = vor.u32 %v375_v10, %v371_v26 }
  0x4e   : > { %v1639_v45 = vsel %vm4283_vm7, %v3169_v13, %v1638_v62  ;;  %v1642_v43 = vsel %vm4283_vm7, %v1640_v23, %v1641_v63  ;;  %v386_v46 = vrot.slane %v384_v37, 4  ;;  %v393_v48 = vshll.u32 %v4288_v4, 16  ;;  %v4318_v62 = vld [vmem:[%s4089_s11 + $0x4c] sm:$0xf] }
  0x4f   : > { %v389_v47 = vrot.slane %v387_v28, 5  ;;  %3473 = vmatmul.mubr.msk.bf16.gmra.mrb[4].mxu0 %vm481_vm3, %v3148_v34  ;;  %v372_v49 = vsel %vm4128_vm4, %v367_v40, %v371_v26  ;;  %v377_v17 = vrot.slane %v376_v42, 4  ;;  %v3178_v15 = vcombine.low %v1639_v45, %v1642_v43  ;;  %v4340_v28 = vld [vmem:[%s4089_s11 + $0x54] sm:$0xf]  ;;  %v4351_v34 = vld [vmem:[%s5154_s1 + $0xe] sm:$0x3] }
  0x50   : > { %v397_v51 = vshrl.u32 %v4288_v4, 16  ;;  %v395_v53 = vrot.slane %v393_v48, 5  ;;  %v403_v63 = vshll.u32 %v4291_v18, 16  ;;  %v3170_v54 = vrot.slane %v3162_v20, 9 }
  0x51   : > { %v390_v16 = vor.u32 %v389_v47, %v386_v46  ;;  %v382_v59 = vsel %vm4128_vm4, %v377_v17, %v381_v12  ;;  %3486 = vmatprep.mubr.msk.bf16.mxu0 %vm481_vm3, %v3178_v15  ;;  %v1649_v3 = vsel %vm4283_vm7, %v4184_v35, %v1648_v33  ;;  %v408_v26 = vshrl.u32 %v4302_v30, 16  ;;  %v3163_v12 = vld [vmem:[%s4089_s11 + $0x24] sm:$0xe]  ;;  %v4356_v17 = vld [vmem:[%s4089_s11 + $0x58] sm:$0xf] }
  0x52   : > { %v399_v0 = vrot.slane %v397_v51, 4  ;;  %v3032_v9 = vcombine.low %v372_v49, %v382_v59  ;;  %v405_v13 = vrot.slane %v403_v63, 5  ;;  %v1646_v20 = vsel %vm4283_vm7, %v3170_v54, %v1645_v25  ;;  %v4365_v54 = vld [vmem:[%s4089_s11 + $0x5c] sm:$0x1] }
  0x53   : > { %v391_v10 = vrot.slane %v390_v16, 4  ;;  %v3179_v23 = vcombine.low %v1646_v20, %v1649_v3  ;;  %v410_v37 = vrot.slane %v408_v26, 4  ;;  %v411_v1 = vshll.u32 %v4302_v30, 16 }
  0x54   : > { %v400_v22 = vor.u32 %v399_v0, %v395_v53  ;;  %3404 = vmatprep.mubr.msk.bf16.mxu1 %vm481_vm3, %v3032_v9  ;;  %v417_v35 = vshll.u32 %v4318_v62, 16  ;;  %v421_v60 = vshrl.u32 %v4318_v62, 16  ;;  %v427_v25 = vshll.u32 %v4322_v55, 16 }
  0x55   : > { %v396_v33 = vsel %vm4128_vm4, %v391_v10, %v395_v53  ;;  %v413_v42 = vrot.slane %v411_v1, 5  ;;  %v3171_v45 = vrot.slane %v3163_v12, 9  ;;  %v1652_v43 = vrot.slane %v4197_v52, 5  ;;  %v3164_v10 = vld [vmem:[%s4089_s11 + $0x30] sm:$0xe] }
  0x56   : > { %v401_v40 = vrot.slane %v400_v22, 4  ;;  %v419_v46 = vrot.slane %v417_v35, 5  ;;  %v423_v47 = vrot.slane %v421_v60, 4  ;;  %v429_v48 = vrot.slane %v427_v25, 5 }
  0x57   : > { %v1655_v49 = vrot.slane %v4209_v61, 5  ;;  %3487 = vmatmul.mubr.msk.bf16.vlgmr.msra.gmra.mrb[0].mxu0 %vm481_vm3, %v3179_v23  ;;  %v414_v51 = vor.u32 %v413_v42, %v410_v37  ;;  %v1653_v16 = vsel %vm4283_vm7, %v3171_v45, %v1652_v43  ;;  %v1654_v53 = vrot.slane %v1652_v43, 4  ;;  %v4386_v42 = vld [vmem:[%s4089_s11 + $0x40] sm:$0xf]  ;;  %v4389_v45 = vld [vmem:[%s4089_s11 + $0x44] sm:$0x1] }
  0x58   : > { %v406_v15 = vsel %vm4128_vm4, %v401_v40, %v405_v13  ;;  %3503 = vmatpush3.bf16.msra.mxu0 %v4140_v41  ;;  %v424_v52 = vor.u32 %v423_v47, %v419_v46  ;;  %v432_v61 = vshrl.u32 %v4340_v28, 16  ;;  %v435_v59 = vshll.u32 %v4340_v28, 16 }
  0x59   : > { %v3033_v63 = vcombine.low %v396_v33, %v406_v15  ;;  %v415_v0 = vrot.slane %v414_v51, 4  ;;  %v1656_v3 = vsel %vm4283_vm7, %v1654_v53, %v1655_v49  ;;  %v441_v26 = vshll.u32 %v4356_v17, 16  ;;  %3694 = vmatprep.subr.msk.bf16.mxu0 %vm506_vm0, %v4351_v34  ;;  %v3165_v33 = vld [vmem:[%s4089_s11 + $0x3c] sm:$0xe] }
  0x5a   : > { %v445_v9 = vshrl.u32 %v4356_v17, 16  ;;  %v425_v41 = vrot.slane %v424_v52, 4  ;;  %v3180_v13 = vcombine.low %v1653_v16, %v1656_v3  ;;  %v434_v20 = vrot.slane %v432_v61, 4  ;;  %v3166_v3 = vld [vmem:[%s4089_s11 + $0x48] sm:$0xe] }
  0x5b   : > { %3405 = vmatmul.mubr.msk.bf16.gmra.mrb[8].mxu1 %vm481_vm3, %v3033_v63  ;;  %v437_v12 = vrot.slane %v435_v59, 5  ;;  %v420_v22 = vsel %vm4128_vm4, %v415_v0, %v419_v46  ;;  %v443_v23 = vrot.slane %v441_v26, 5  ;;  %v451_v1 = vshll.u32 %v4365_v54, 16  ;;  %v4404_v59 = vld [vmem:[%s4089_s11 + $0x4c] sm:$0xf] }
  0x5c   : > { %v447_v37 = vrot.slane %v445_v9, 4  ;;  %v430_v35 = vsel %vm4128_vm4, %v425_v41, %v429_v48  ;;  %3490 = vmatprep.mubr.msk.bf16.mxu0 %vm481_vm3, %v3180_v13  ;;  %v3172_v25 = vrot.slane %v3164_v10, 9  ;;  %v1659_v40 = vrot.slane %v4239_v50, 5  ;;  %v4407_v0 = vld [vmem:[%s4089_s11 + $0x50] sm:$0x1] }
  0x5d   : > { %v438_v60 = vor.u32 %v437_v12, %v434_v20  ;;  %v3034_v43 = vcombine.low %v420_v22, %v430_v35  ;;  %v453_v47 = vrot.slane %v451_v1, 5  ;;  %v1662_v49 = vrot.slane %v4249_v58, 5  ;;  %v4415_v20 = vld [vmem:[%s4089_s11 + $0x58] sm:$0xf]  ;;  %v4418_v12 = vld [vmem:[%s4089_s11 + $0x5c] sm:$0x1] }
  0x5e   : > { %v448_v46 = vor.u32 %v447_v37, %v443_v23  ;;  %v1660_v48 = vsel %vm4283_vm7, %v3172_v25, %v1659_v40  ;;  %v1661_v51 = vrot.slane %v1659_v40, 4  ;;  %v3173_v16 = vrot.slane %v3165_v33, 9  ;;  %5173 = vst [vmem:[#allocation9_spill] sm:$0xff] %v4418_v12  ;;  %v4428_v35 = vld [vmem:[%s4089_s11 + $0x64] sm:$0xf] }
  0x5f   : > { %v439_v15 = vrot.slane %v438_v60, 4  ;;  %3408 = vmatprep.mubr.msk.bf16.mxu1 %vm481_vm3, %v3034_v43  ;;  %v1666_v53 = vrot.slane %v4386_v42, 5  ;;  %v1669_v63 = vrot.slane %v4389_v45, 5  ;;  %v3044_v61 = vcombine.low %v4092_v6, %v4095_v7  ;;  %v3167_v6 = vld [vmem:[%s4089_s11 + $0x54] sm:$0xe]  ;;  %5174 = vst [vmem:[#allocation10_spill] sm:$0xff] %v4428_v35 }
  0x60   : > { %v449_v50 = vrot.slane %v448_v46, 4  ;;  %v1663_v58 = vsel %vm4283_vm7, %v1661_v51, %v1662_v49  ;;  %v1673_v37 = vrot.slane %v4404_v59, 5  ;;  %v1676_v1 = vrot.slane %v4407_v0, 5  ;;  %v4431_v60 = vld [vmem:[%s4089_s11 + $0x68] sm:$0x1] }
  0x61   : > { %v444_v52 = vsel %vm4128_vm4, %v439_v15, %v443_v23  ;;  %v3181_v9 = vcombine.low %v1660_v48, %v1663_v58  ;;  %v1667_v10 = vsel %vm4283_vm7, %v3173_v16, %v1666_v53  ;;  %v1668_v41 = vrot.slane %v1666_v53, 4  ;;  %5175 = vst [vmem:[#allocation11_spill] sm:$0xff] %v4431_v60 }
  0x62   : > { %v454_v26 = vsel %vm4128_vm4, %v449_v50, %v453_v47  ;;  %v3174_v23 = vrot.slane %v3166_v3, 9  ;;  %v1675_v40 = vrot.slane %v1673_v37, 4  ;;  %v3175_v43 = vrot.slane %v3167_v6, 9  ;;  %v3168_v47 = vld [vmem:[%s4089_s11 + $0x60] sm:$0xe] }
  0x63   : > { %v3035_v13 = vcombine.low %v444_v52, %v454_v26  ;;  %3491 = vmatmul.mubr.msk.bf16.gmra.mrb[4].mxu0 %vm481_vm3, %v3181_v9  ;;  %v1670_v22 = vsel %vm4283_vm7, %v1668_v41, %v1669_v63  ;;  %v1680_v46 = vrot.slane %v4415_v20, 5  ;;  %v807_v49 = vrot.slane %v4133_v36, 5  ;;  %v773_v3 = vld [vmem:[%s4089_s11 + $0x18] sm:$0xe] }
  0x64   : > { %v3182_v33 = vcombine.low %v1667_v10, %v1670_v22  ;;  %v1674_v25 = vsel %vm4283_vm7, %v3174_v23, %v1673_v37  ;;  %v1683_v15 = vrot.slane %v4418_v12, 5  ;;  %v1677_v48 = vsel %vm4283_vm7, %v1675_v40, %v1676_v1  ;;  %v775_v1 = vld [vmem:[%s4089_s11 + $0x30] sm:$0xe] }
  0x65   : > { %3409 = vmatmul.mubr.msk.bf16.gmra.mrb[12].mxu1 %vm481_vm3, %v3035_v13  ;;  %v1681_v51 = vsel %vm4283_vm7, %v3175_v43, %v1680_v46  ;;  %v1682_v16 = vrot.slane %v1680_v46, 4  ;;  %v1687_v50 = vrot.slane %v4428_v35, 5  ;;  %v3045_v53 = vcombine.low %v4124_v31, %v4133_v36  ;;  %v774_v36 = vld [vmem:[%s4089_s11 + $0x24] sm:$0xe]  ;;  %v4737_v12 = vld [vmem:[%s4089_s11 + $0x70] sm:$0xf] }
  0x66   : > { %3414 = vmatprep.mubr.msk.bf16.mxu1 %vm481_vm3, %v3044_v61  ;;  %3494 = vmatprep.mubr.msk.bf16.mxu0 %vm481_vm3, %v3182_v33  ;;  %v3183_v63 = vcombine.low %v1674_v25, %v1677_v48  ;;  %v3176_v52 = vrot.slane %v3168_v47, 9  ;;  %v1690_v58 = vrot.slane %v4431_v60, 5  ;;  %v772_v61 = vld [vmem:[%s4089_s11 + $0xc] sm:$0xe]  ;;  %v810_v26 = vrot.slane %v4143_v44, 5 }
  0x67   : > { %v3046_v9 = vcombine.low %v4172_v21, %v4179_v27  ;;  %v1684_v10 = vsel %vm4283_vm7, %v1682_v16, %v1683_v15  ;;  %v1689_v41 = vrot.slane %v1687_v50, 4  ;;  %v905_v31 = vsel %vm506_vm0, %v4203_v57, 0  ;;  %v4463_v44 = vld [vmem:[%s5154_s1 + $0x6] sm:$0x3]  ;;  %v3783_v16 = vld [vmem:[%s4089_s11 + $0x18] sm:$0xff]  }
  0x68   : > { %v3184_v13 = vcombine.low %v1681_v51, %v1684_v10  ;;  %v3061_v6 = vrot.slane %v772_v61, 9  ;;  %v809_v22 = vrot.slane %v807_v49, 4  ;;  %v3062_v23 = vrot.slane %v773_v3, 9  ;;  %v4709_v60 = vld [vmem:[%s4089_s11 + $0x64] sm:$0xf] }
  0x69   : > { %v1688_v21 = vsel %vm4283_vm7, %v3176_v52, %v1687_v50  ;;  %v1691_v57 = vsel %vm4283_vm7, %v1689_v41, %v1690_v58  ;;  %v814_v37 = vrot.slane %v4179_v27, 5  ;;  %v817_v40 = vrot.slane %v4187_v38, 5  ;;  %5176 = vst [vmem:[#allocation12_spill] sm:$0xff] %v4709_v60 }
  0x6a   : > { %v4476_v33 = vsel %vm4283_vm7, %v3061_v6, %v807_v49  ;;  %v4480_v25 = vsel %vm4283_vm7, %v809_v22, %v810_v26  ;;  %v3063_v43 = vrot.slane %v774_v36, 9  ;;  %v3185_v49 = vcombine.low %v1688_v21, %v1691_v57  ;;  %v3229_v26 = vld [vmem:[%s4089_s11 + $0x18] sm:$0xf]  ;;  %v3785_v57 = vld [vmem:[%s4089_s11 + $0x24] sm:$0xff]  }
  0x6b   : > { %3495 = vmatmul.mubr.msk.bf16.gmra.mrb[8].mxu0 %vm481_vm3, %v3183_v63  ;;  %v3070_v46 = vcombine.low %v4476_v33, %v4480_v25  ;;  %v4487_v27 = vsel %vm4283_vm7, %v3062_v23, %v814_v37  ;;  %v816_v47 = vrot.slane %v814_v37, 4  ;;  %v821_v15 = vrot.slane %v4219_v19, 5 }
  0x6c   : > { %3498 = vmatprep.mubr.msk.bf16.mxu0 %vm481_vm3, %v3184_v13  ;;  %v824_v48 = vrot.slane %v4229_v29, 5  ;;  %v3064_v38 = vrot.slane %v775_v1, 9  ;;  %v3047_v51 = vcombine.low %v4215_v11, %v4219_v19  ;;  %v831_v63 = vrot.slane %v4265_v39, 5  ;;  %v776_v19 = vld [vmem:[%s4089_s11 + $0x3c] sm:$0xe] }
  0x6d   : > { %3415 = vmatmul.mubr.msk.bf16.vlgmr.msra.gmra.mrb[0].mxu1 %vm481_vm3, %v3045_v53  ;;  %v4498_v50 = vsel %vm4283_vm7, %v816_v47, %v817_v40  ;;  %v828_v53 = vrot.slane %v4260_v24, 5  ;;  %v3048_v52 = vcombine.low %v4254_v14, %v4260_v24  ;;  %v4508_v58 = vsel %vm4283_vm7, %v3063_v43, %v821_v15  ;;  %v771_v14 = vld [vmem:[%s4089_s11] sm:$0xe]  ;;  %v777_v1 = vld [vmem:[%s4089_s11 + $0x48] sm:$0xe] }
  0x6e   : > { %3418 = vmatprep.mubr.msk.bf16.mxu1 %vm481_vm3, %v3046_v9  ;;  %3431 = vmatpush3.bf16.msra.mxu1 %v905_v31  ;;  %v3071_v29 = vcombine.low %v4487_v27, %v4498_v50  ;;  %v823_v11 = vrot.slane %v821_v15, 4  ;;  %v800_v61 = vrot.slane %v4095_v7, 5  ;;  %v3065_v10 = vrot.slane %v776_v19, 9  ;;  %v4536_v31 = vld [vmem:[%s4089_s11 + $0x1c] sm:$0xf] }
  0x6f   : > { %3689 = vmatprep.subr.msk.bf16.mxu1 %vm506_vm0, %v4463_v44  ;;  %v4514_v3 = vsel %vm4283_vm7, %v3064_v38, %v828_v53  ;;  %v830_v39 = vrot.slane %v828_v53, 4  ;;  %v803_v41 = vrot.slane %v4098_v8, 5  ;;  %v3060_v36 = vrot.slane %v771_v14, 9  ;;  %v4562_v38 = vld [vmem:[%s5154_s1 + $0x10] sm:$0x3] }
  0x70   : > { %v4520_v24 = vsel %vm4283_vm7, %v823_v11, %v824_v48  ;;  %v802_v6 = vrot.slane %v800_v61, 4  ;;  %v835_v22 = vrot.slane %v4288_v4, 5  ;;  %v838_v23 = vrot.slane %v4291_v18, 5  ;;  %v4583_v14 = vld [vmem:[%s4089_s11 + $0x28] sm:$0xf] }
  0x71   : > { %v4529_v9 = vsel %vm4283_vm7, %v830_v39, %v831_v63  ;;  %v3049_v21 = vcombine.low %v4277_v56, %v4288_v4  ;;  %v2085_v37 = vshrl.u32 %v3229_v26, 16  ;;  %v2088_v8 = vshll.u32 %v3229_v26, 16  ;;  %v3787_v4 = vld [vmem:[%s4089_s11 + $0x30] sm:$0xff]   ;;  %v3802_v27 = vld [vmem:[%s5154_s1 + $0x8] sm:$0x3] }
  0x72   : > { %v2094_v40 = vshll.u32 %v4536_v31, 16  ;;  %v2098_v43 = vshrl.u32 %v4536_v31, 16  ;;  %v4548_v47 = vsel %vm4283_vm7, %v3065_v10, %v835_v22  ;;  %v2327_v18 = vsel %vm506_vm0, %v4351_v34, 0  ;;  %v4685_v50 = vld [vmem:[%s4089_s11 + $0x44] sm:$0x1] }
  0x73   : > { %3499 = vmatmul.mubr.msk.bf16.gmra.mrb[12].mxu0 %vm481_vm3, %v3185_v49  ;;  %v837_v49 = vrot.slane %v835_v22, 4  ;;  %v3050_v56 = vcombine.low %v4302_v30, %v4318_v62  ;;  %v801_v15 = vsel %vm4283_vm7, %v3060_v36, %v800_v61  ;;  %v804_v48 = vsel %vm4283_vm7, %v802_v6, %v803_v41  ;;  %v4570_v30 = vld [vmem:[%s4089_s11 + $0x20] sm:$0x1]  ;;  %v3232_v61 = vld [vmem:[%s4089_s11 + $0x24] sm:$0xf] }
  0x74   : > { %3504 = vmatprep.mubr.msk.bf16.mxu0 %vm481_vm3, %v3783_v16  ;;  %v3066_v34 = vrot.slane %v777_v1, 9  ;;  %v2087_v16 = vrot.slane %v2085_v37, 4  ;;  %v2090_v53 = vrot.slane %v2088_v8, 5  ;;  %v4576_v11 = vrot.slane %v2094_v40, 5  ;;  %v778_v6 = vld [vmem:[%s4089_s11 + $0x54] sm:$0xe] }
  0x75   : > { %3419 = vmatmul.mubr.msk.bf16.gmra.mrb[4].mxu1 %vm481_vm3, %v3047_v51  ;;  %v4566_v51 = vsel %vm4283_vm7, %v837_v49, %v838_v23  ;;  %v2100_v19 = vrot.slane %v2098_v43, 4  ;;  %v845_v39 = vrot.slane %v4322_v55, 5  ;;  %v3051_v10 = vcombine.low %v4340_v28, %v4356_v17  ;;  %v3235_v55 = vld [vmem:[%s4089_s11 + $0x30] sm:$0xf]  ;;  %v3789_v22 = vld [vmem:[%s4089_s11 + $0x3c] sm:$0xff]   ;;  %v3790_v1 = vld [vmem:[%s4089_s11 + $0x48] sm:$0xff]  }
  0x76   : > { %3422 = vmatprep.mubr.msk.bf16.mxu1 %vm481_vm3, %v3048_v52  ;;  %v842_v52 = vrot.slane %v4318_v62, 5  ;;  %v3069_v41 = vcombine.low %v801_v15, %v804_v48  ;;  %v2104_v36 = vshll.u32 %v4570_v30, 16  ;;  %v2091_v23 = vor.u32 %v2090_v53, %v2087_v16  ;;  %v4602_v8 = vld [vmem:[%s4089_s11 + $0x34] sm:$0xf]  ;;  %v3247_v7 = vld [vmem:[%s4089_s11 + $0x60] sm:$0xf] }
  0x77   : > { %v2101_v28 = vor.u32 %v2100_v19, %v4576_v11  ;;  %v2118_v40 = vshll.u32 %v4583_v14, 16  ;;  %v2122_v43 = vshrl.u32 %v4583_v14, 16  ;;  %v849_v15 = vrot.slane %v4356_v17, 5 }
  0x78   : > { %v4587_v62 = vsel %vm4283_vm7, %v3066_v34, %v842_v52  ;;  %v844_v26 = vrot.slane %v842_v52, 4  ;;  %v2142_v48 = vshll.u32 %v4602_v8, 16  ;;  %v2146_v34 = vshrl.u32 %v4602_v8, 16 }
  0x79   : > { %v852_v16 = vrot.slane %v4365_v54, 5  ;;  %v2092_v53 = vrot.slane %v2091_v23, 4  ;;  %v2106_v52 = vrot.slane %v2104_v36, 5  ;;  %v2102_v17 = vrot.slane %v2101_v28, 4  ;;  %v4625_v36 = vld [vmem:[%s4089_s11 + $0x2c] sm:$0x1] }
  0x7a   : > { %v4599_v37 = vsel %vm4283_vm7, %v844_v26, %v845_v39  ;;  %v4621_v26 = vrot.slane %v2118_v40, 5  ;;  %v4632_v23 = vld [vmem:[%s4089_s11 + $0x38] sm:$0x1]  ;;  %v1107_v40 = vsel %vm506_vm0, %v4463_v44, 0 }
  0x7b   : > { %3505 = vmatmul.mubr.msk.bf16.vlgmr.msra.gmra.mrb[0].mxu0 %vm481_vm3, %v3785_v57  ;;  %v2112_v57 = vshll.u32 %v3232_v61, 16  ;;  %v3791_v28 = vld [vmem:[%s4089_s11 + $0x54] sm:$0xff]   ;;  %v2152_v44 = vshll.u32 %v4632_v23, 16 }
  0x7c   : > { %3521 = vmatpush3.bf16.msra.mxu0 %v2327_v18  ;;  %3508 = vmatprep.mubr.msk.bf16.mxu0 %vm481_vm3, %v3787_v4  ;;  %v2133_v18 = vshrl.u32 %v3235_v55, 16  ;;  %v3067_v4 = vrot.slane %v778_v6, 9 }
  0x7d   : > { %3423 = vmatmul.mubr.msk.bf16.gmra.mrb[8].mxu1 %vm481_vm3, %v3049_v21  ;;  %3695 = vmatprep.subr.msk.bf16.mxu0 %vm506_vm0, %v4562_v38  ;;  %v2109_v21 = vshrl.u32 %v3232_v61, 16  ;;  %v851_v61 = vrot.slane %v849_v15, 4  ;;  %v2114_v54 = vrot.slane %v2112_v57, 5  ;;  %v2148_v57 = vrot.slane %v2146_v34, 4  ;;  %v3241_v34 = vld [vmem:[%s4089_s11 + $0x48] sm:$0xf] }
  0x7e   : > { %3426 = vmatprep.mubr.msk.bf16.mxu1 %vm481_vm3, %v3050_v56  ;;  %v2136_v56 = vshll.u32 %v3235_v55, 16  ;;  %v4617_v19 = vsel %vm4283_vm7, %v3067_v4, %v849_v15  ;;  %v2124_v55 = vrot.slane %v2122_v43, 4  ;;  %v2135_v6 = vrot.slane %v2133_v18, 4  ;;  %v4643_v43 = vld [vmem:[%s4089_s11 + $0x40] sm:$0xf] }
  0x7f   : > { %v2111_v39 = vrot.slane %v2109_v21, 4  ;;  %v4634_v21 = vrot.slane %v2142_v48, 5  ;;  %v3792_v18 = vld [vmem:[%s4089_s11 + $0x60] sm:$0xff]   ;;  %v2107_v4 = vsel %vm4128_vm4, %v2102_v17, %v2106_v52  ;;  %v2128_v48 = vshll.u32 %v4625_v36, 16 }
  0x80   : > { %v2181_v52 = vshrl.u32 %v3241_v34, 16  ;;  %v2184_v17 = vshll.u32 %v3241_v34, 16  ;;  %v2154_v33 = vrot.slane %v2152_v44, 5 }
  0x81   : > { %v2115_v15 = vor.u32 %v2114_v54, %v2111_v39  ;;  %v2149_v63 = vor.u32 %v2148_v57, %v4634_v21  ;;  %v3244_v57 = vld [vmem:[%s4089_s11 + $0x54] sm:$0xf] }
  0x82   : > { %v2208_v34 = vshll.u32 %v3244_v57, 16 }
  0x83   : > { %3509 = vmatmul.mubr.msk.bf16.gmra.mrb[4].mxu0 %vm481_vm3, %v3789_v22  ;;  %v2138_v22 = vrot.slane %v2136_v56, 5  ;;  %v2097_v56 = vsel %vm4128_vm4, %v2092_v53, %v4576_v11  ;;  %v2166_v11 = vshll.u32 %v4643_v43, 16  ;;  %v2170_v53 = vshrl.u32 %v4643_v43, 16 }
  0x84   : > { %3512 = vmatprep.mubr.msk.bf16.mxu0 %vm481_vm3, %v3790_v1  ;;  %v3254_v54 = vcombine.low %v2097_v56, %v2107_v4  ;;  %v2150_v56 = vrot.slane %v2149_v63, 4  ;;  %v4690_v63 = vld [vmem:[%s4089_s11 + $0x50] sm:$0x1] }
  0x85   : > { %3427 = vmatmul.mubr.msk.bf16.gmra.mrb[12].mxu1 %vm481_vm3, %v3051_v10  ;;  %v4629_v10 = vsel %vm4283_vm7, %v851_v61, %v852_v16  ;;  %v4654_v16 = vld [vmem:[%s4089_s11 + $0x4c] sm:$0xf]  ;;  %v2125_v61 = vor.u32 %v2124_v55, %v4621_v26  ;;  %v2139_v1 = vor.u32 %v2138_v22, %v2135_v6  ;;  %v2116_v55 = vrot.slane %v2115_v15, 4 }
  0x86   : > { %3432 = vmatprep.mubr.msk.bf16.mxu1 %vm481_vm3, %v3069_v41  ;;  %v3238_v41 = vld [vmem:[%s4089_s11 + $0x3c] sm:$0xf]  ;;  %v2190_v39 = vshll.u32 %v4654_v16, 16  ;;  %v2130_v6 = vrot.slane %v2128_v48, 5  ;;  %v2194_v22 = vshrl.u32 %v4654_v16, 16  ;;  %v4678_v15 = vrot.slane %v2166_v11, 5 }
  0x87   : > { %v2157_v49 = vshrl.u32 %v3238_v41, 16  ;;  %v2160_v13 = vshll.u32 %v3238_v41, 16  ;;  %v2126_v41 = vrot.slane %v2125_v61, 4  ;;  %v2172_v48 = vrot.slane %v2170_v53, 4 }
  0x88   : > { %v1376_v11 = vshll.u32 %v4404_v59, 16  ;;  %v2121_v53 = vsel %vm4128_vm4, %v2116_v55, %v4621_v26  ;;  %v2155_v26 = vsel %vm4128_vm4, %v2150_v56, %v2154_v33  ;;  %v5178_v33 = vcombine.low %v4514_v3, %v4529_v9  ;;  %v4728_v56 = vld [vmem:[%s4089_s11 + $0x5c] sm:$0x1] }
  0x89   : > { %v2159_v25 = vrot.slane %v2157_v49, 4  ;;  %v2162_v4 = vrot.slane %v2160_v13, 5  ;;  %v4687_v49 = vrot.slane %v2190_v39, 5  ;;  %v2196_v13 = vrot.slane %v2194_v22, 4 }
  0x8b   : > { %3513 = vmatmul.mubr.msk.bf16.gmra.mrb[8].mxu0 %vm481_vm3, %v3791_v28  ;;  %v2140_v28 = vrot.slane %v2139_v1, 4  ;;  %v2186_v1 = vrot.slane %v2184_v17, 5  ;;  %v2581_v17 = vsel %vm506_vm0, %v4562_v38, 0  ;;  %v2163_v22 = vor.u32 %v2162_v4, %v2159_v25 }
  0x8c   : > { %3516 = vmatprep.mubr.msk.bf16.mxu0 %vm481_vm3, %v3792_v18  ;;  %v3793_v18 = vld [vmem:[%s4089_s11 + $0x6c] sm:$0xff]   ;;  %v2200_v38 = vshll.u32 %v4690_v63, 16  ;;  %v2229_v4 = vshrl.u32 %v3247_v7, 16 }
  0x8d   : > { %3433 = vmatmul.mubr.msk.bf16.vlgmr.msra.gmra.mrb[0].mxu1 %vm481_vm3, %v3070_v46  ;;  %v4675_v46 = vld [vmem:[%s4089_s11 + $0x58] sm:$0xf]  ;;  %v2145_v39 = vsel %vm4128_vm4, %v2140_v28, %v4634_v21  ;;  %v5177_v21 = vcombine.low %v4508_v58, %v4520_v24  ;;  %v2210_v28 = vrot.slane %v2208_v34, 5  ;;  %v2232_v58 = vshll.u32 %v3247_v7, 16 }
  0x8e   : > { %3436 = vmatprep.mubr.msk.bf16.mxu1 %vm481_vm3, %v3071_v29  ;;  %3449 = vmatpush3.bf16.msra.mxu1 %v1107_v40  ;;  %v2183_v29 = vrot.slane %v2181_v52, 4  ;;  %v2205_v40 = vshrl.u32 %v3244_v57, 16  ;;  %v2214_v61 = vshll.u32 %v4675_v46, 16  ;;  %v2218_v44 = vshrl.u32 %v4675_v46, 16 }
  0x8f   : > { %3691 = vmatprep.subr.msk.bf16.mxu1 %vm506_vm0, %v3802_v27  ;;  %v2131_v52 = vsel %vm4128_vm4, %v2126_v41, %v2130_v6  ;;  %v2173_v57 = vor.u32 %v2172_v48, %v4678_v15  ;;  %v2176_v27 = vshll.u32 %v4685_v50, 16  ;;  %v2197_v41 = vor.u32 %v2196_v13, %v4687_v49 }
  0x90   : > { %v2187_v55 = vor.u32 %v2186_v1, %v2183_v29  ;;  %v2207_v6 = vrot.slane %v2205_v40, 4  ;;  %v4721_v25 = vrot.slane %v2214_v61, 5  ;;  %v2238_v24 = vshll.u32 %v4709_v60, 16 }
  0x91   : > { %v1380_v48 = vshrl.u32 %v4404_v59, 16  ;;  %v2164_v29 = vrot.slane %v2163_v22, 4  ;;  %v2174_v1 = vrot.slane %v2173_v57, 4  ;;  %v2178_v40 = vrot.slane %v2176_v27, 5  ;;  %v4749_v27 = vld [vmem:[%s4089_s11 + $0x68] sm:$0x1] }
  0x92   : > { %v3255_v13 = vcombine.low %v2121_v53, %v2131_v52  ;;  %v3256_v34 = vcombine.low %v2145_v39, %v2155_v26  ;;  %v2188_v3 = vrot.slane %v2187_v55, 4  ;;  %v2202_v9 = vrot.slane %v2200_v38, 5 }
  0x93   : > { %3517 = vmatmul.mubr.msk.bf16.gmra.mrb[12].mxu0 %vm481_vm3, %v3793_v18  ;;  %v2220_v18 = vrot.slane %v2218_v44, 4  ;;  %v2198_v61 = vrot.slane %v2197_v41, 4  ;;  %v2211_v44 = vor.u32 %v2210_v28, %v2207_v6  ;;  %v2224_v7 = vshll.u32 %v4728_v56, 16 }
  0x94   : > { %3522 = vmatprep.mubr.msk.bf16.mxu0 %vm481_vm3, %v3254_v54  ;;  %v2242_v54 = vshrl.u32 %v4709_v60, 16  ;;  %v2231_v35 = vrot.slane %v2229_v4, 4  ;;  %v2234_v60 = vrot.slane %v2232_v58, 5  ;;  %v4739_v59 = vrot.slane %v2238_v24, 5 }
  0x95   : > { %3437 = vmatmul.mubr.msk.bf16.gmra.mrb[4].mxu1 %vm481_vm3, %v5177_v21  ;;  %v2221_v21 = vor.u32 %v2220_v18, %v4721_v25  ;;  %v4741_v57 = vrot.slane %v1376_v11, 5  ;;  %v1382_v53 = vrot.slane %v1380_v48, 4  ;;  %v2169_v52 = vsel %vm4128_vm4, %v2164_v29, %v4678_v15 }
  0x96   : > { %3440 = vmatprep.mubr.msk.bf16.mxu1 %vm481_vm3, %v5178_v33  ;;  %v3250_v33 = vld [vmem:[%s4089_s11 + $0x6c] sm:$0xf]  ;;  %v2244_v22 = vrot.slane %v2242_v54, 4  ;;  %v2179_v39 = vsel %vm4128_vm4, %v2174_v1, %v2178_v40  ;;  %v2262_v38 = vshll.u32 %v4737_v12, 16  ;;  %v2266_v6 = vshrl.u32 %v4737_v12, 16 }
  0x97   : > { %v2253_v26 = vshrl.u32 %v3250_v33, 16  ;;  %v2256_v55 = vshll.u32 %v3250_v33, 16  ;;  %v5179_v11 = vcombine.low %v4548_v47, %v4566_v51  ;;  %v2193_v15 = vsel %vm4128_vm4, %v2188_v3, %v4687_v49  ;;  %v3794_v40 = vld [vmem:[%s4089_s11 + $0xc] sm:$0xff]  }
  0x98   : > { %v2203_v41 = vsel %vm4128_vm4, %v2198_v61, %v2202_v9  ;;  %v2212_v28 = vrot.slane %v2211_v44, 4  ;;  %v2226_v18 = vrot.slane %v2224_v7, 5  ;;  %v5180_v4 = vcombine.low %v4587_v62, %v4599_v37 }
  0x99   : > { %v2222_v47 = vrot.slane %v2221_v21, 4  ;;  %v2235_v51 = vor.u32 %v2234_v60, %v2231_v35  ;;  %v2248_v49 = vshll.u32 %v4749_v27, 16  ;;  %v1383_v58 = vor.u32 %v1382_v53, %v4741_v57  ;;  %v4778_v60 = vld [vmem:[%s4089_s11 + $0x74] sm:$0x1]  ;;  %v3135_v21 = vld [vmem:[%s4089_s11 + $0x48] sm:$0xf] }
  0x9a   : > { %v1386_v24 = vshll.u32 %v4407_v0, 16  ;;  %v3257_v54 = vcombine.low %v2169_v52, %v2179_v39  ;;  %v2255_v48 = vrot.slane %v2253_v26, 4  ;;  %v2258_v62 = vrot.slane %v2256_v55, 5 }
  0x9b   : > { %3523 = vmatmul.mubr.msk.bf16.vlgmr.msra.gmra.mrb[0].mxu0 %vm481_vm3, %v3255_v13  ;;  %v4772_v37 = vrot.slane %v2262_v38, 5  ;;  %v2268_v29 = vrot.slane %v2266_v6, 4  ;;  %v3258_v1 = vcombine.low %v2193_v15, %v2203_v41  ;;  %v2217_v35 = vsel %vm4128_vm4, %v2212_v28, %v4721_v25 }
  0x9c   : > { %3539 = vmatpush3.bf16.msra.mxu0 %v2581_v17  ;;  %3526 = vmatprep.mubr.msk.bf16.mxu0 %vm481_vm3, %v3256_v34  ;;  %v2245_v17 = vor.u32 %v2244_v22, %v4739_v59  ;;  %v2227_v13 = vsel %vm4128_vm4, %v2222_v47, %v2226_v18  ;;  %v2236_v0 = vrot.slane %v2235_v51, 4  ;;  %v2250_v3 = vrot.slane %v2248_v49, 5  ;;  %v3270_v22 = vld [vmem:[%s4089_s11 + $0x18] sm:$0xe]  ;;  %v3796_v51 = vld [vmem:[%s4089_s11 + $0x24] sm:$0xff]  }
  0x9d   : > { %3441 = vmatmul.mubr.msk.bf16.gmra.mrb[8].mxu1 %vm481_vm3, %v5179_v11  ;;  %v1384_v9 = vrot.slane %v1383_v58, 4  ;;  %v1388_v61 = vrot.slane %v1386_v24, 5  ;;  %v2476_v44 = vrot.slane %v4536_v31, 5  ;;  %v2259_v7 = vor.u32 %v2258_v62, %v2255_v48  ;;  %v3272_v62 = vld [vmem:[%s4089_s11 + $0x30] sm:$0xe] }
  0x9e   : > { %3444 = vmatprep.mubr.msk.bf16.mxu1 %vm481_vm3, %v5180_v4  ;;  %v2246_v34 = vrot.slane %v2245_v17, 4  ;;  %v2269_v33 = vor.u32 %v2268_v29, %v4772_v37  ;;  %v2272_v25 = vshll.u32 %v4778_v60, 16  ;;  %v5181_v53 = vcombine.low %v4617_v19, %v4629_v10  ;;  %v3132_v4 = vld [vmem:[%s4089_s11 + $0x3c] sm:$0xf] }
  0x9f   : > { %v3259_v52 = vcombine.low %v2217_v35, %v2227_v13  ;;  %v2241_v31 = vsel %vm4128_vm4, %v2236_v0, %v4739_v59  ;;  %v1367_v26 = vshrl.u32 %v3135_v21, 16  ;;  %v1370_v55 = vshll.u32 %v3135_v21, 16  ;;  %v3795_v59 = vld [vmem:[%s4089_s11 + $0x18] sm:$0xff]  }
  0xa0   : > { %v2251_v39 = vsel %vm4128_vm4, %v2246_v34, %v2250_v3  ;;  %v3278_v19 = vrot.slane %v3270_v22, 9  ;;  %v2478_v10 = vrot.slane %v2476_v44, 4  ;;  %v2479_v38 = vrot.slane %v4570_v30, 5  ;;  %v3271_v30 = vld [vmem:[%s4089_s11 + $0x24] sm:$0xe]  ;;  %v3798_v22 = vld [vmem:[%s4089_s11 + $0x3c] sm:$0xff]  }
  0xa1   : > { %v1389_v6 = vsel %vm4128_vm4, %v1384_v9, %v1388_v61  ;;  %v2260_v11 = vrot.slane %v2259_v7, 4  ;;  %v2270_v15 = vrot.slane %v2269_v33, 4  ;;  %v2274_v41 = vrot.slane %v2272_v25, 5 }
  0xa2   : > { %v1369_v28 = vrot.slane %v1367_v26, 4  ;;  %v3260_v18 = vcombine.low %v2241_v31, %v2251_v39  ;;  %v1372_v47 = vrot.slane %v1370_v55, 5  ;;  %v2477_v17 = vsel %vm4283_vm7, %v3278_v19, %v2476_v44  ;;  %v3138_v26 = vld [vmem:[%s4089_s11 + $0x54] sm:$0xf] }
  0xa3   : > { %3527 = vmatmul.mubr.msk.bf16.gmra.mrb[4].mxu0 %vm481_vm3, %v3257_v54  ;;  %v2480_v49 = vsel %vm4283_vm7, %v2478_v10, %v2479_v38  ;;  %v2483_v58 = vrot.slane %v4583_v14, 5  ;;  %v2265_v54 = vsel %vm4128_vm4, %v2260_v11, %v4772_v37  ;;  %v2275_v48 = vsel %vm4128_vm4, %v2270_v15, %v2274_v41  ;;  %v3274_v38 = vld [vmem:[%s4089_s11 + $0x48] sm:$0xe] }
  0xa4   : > { %3530 = vmatprep.mubr.msk.bf16.mxu0 %vm481_vm3, %v3258_v1  ;;  %v1373_v24 = vor.u32 %v1372_v47, %v1369_v28  ;;  %v2490_v29 = vrot.slane %v4602_v8, 5  ;;  %v1343_v1 = vshrl.u32 %v3132_v4, 16  ;;  %v1346_v35 = vshll.u32 %v3132_v4, 16 }
  0xa5   : > { %3445 = vmatmul.mubr.msk.bf16.gmra.mrb[12].mxu1 %vm481_vm3, %v5181_v53  ;;  %v1352_v14 = vshll.u32 %v4386_v42, 16  ;;  %v3279_v37 = vrot.slane %v3271_v30, 9  ;;  %v2486_v8 = vrot.slane %v4625_v36, 5  ;;  %v3287_v0 = vcombine.low %v2477_v17, %v2480_v49  ;;  %v3799_v17 = vld [vmem:[%s4089_s11 + $0x48] sm:$0xff]  }
  0xa6   : > { %3450 = vmatprep.mubr.msk.bf16.mxu1 %vm481_vm3, %v3794_v40  ;;  %v1356_v40 = vshrl.u32 %v4386_v42, 16  ;;  %v1374_v13 = vrot.slane %v1373_v24, 4  ;;  %v2485_v34 = vrot.slane %v2483_v58, 4  ;;  %v3280_v3 = vrot.slane %v3272_v62, 9  ;;  %v3800_v24 = vld [vmem:[%s4089_s11 + $0x54] sm:$0xff]  }
  0xa7   : > { %v3261_v61 = vcombine.low %v2265_v54, %v2275_v48  ;;  %v2492_v44 = vrot.slane %v2490_v29, 4  ;;  %v2493_v42 = vrot.slane %v4632_v23, 5  ;;  %v1345_v7 = vrot.slane %v1343_v1, 4 }
  0xa8   : > { %v1379_v9 = vsel %vm4128_vm4, %v1374_v13, %v4741_v57  ;;  %v1348_v33 = vrot.slane %v1346_v35, 5  ;;  %v4834_v25 = vrot.slane %v1352_v14, 5  ;;  %v1358_v36 = vrot.slane %v1356_v40, 4 }
  0xa9   : > { %v4831_v21 = vcombine.low %v1379_v9, %v1389_v6  ;;  %v2484_v53 = vsel %vm4283_vm7, %v3279_v37, %v2483_v58  ;;  %v2487_v57 = vsel %vm4283_vm7, %v2485_v34, %v2486_v8  ;;  %v2491_v23 = vsel %vm4283_vm7, %v3280_v3, %v2490_v29  ;;  %v3141_v29 = vld [vmem:[%s4089_s11 + $0x60] sm:$0xf]  ;;  %v3275_v37 = vld [vmem:[%s4089_s11 + $0x54] sm:$0xe]  ;;  %v5182_v8 = vld [vmem:[#allocation12_spill] sm:$0xff] }
  0xaa   : > { %v2497_v31 = vrot.slane %v4643_v43, 5  ;;  %v1362_v39 = vshll.u32 %v4389_v45, 16  ;;  %v2494_v55 = vsel %vm4283_vm7, %v2492_v44, %v2493_v42  ;;  %v1349_v19 = vor.u32 %v1348_v33, %v1345_v7  ;;  %v5183_v9 = vld [vmem:[#allocation10_spill] sm:$0xff]  ;;  %v5184_v33 = vld [vmem:[#allocation9_spill] sm:$0xff] }
  0xab   : > { %3531 = vmatmul.mubr.msk.bf16.gmra.mrb[8].mxu0 %vm481_vm3, %v3259_v52  ;;  %v3273_v52 = vld [vmem:[%s4089_s11 + $0x3c] sm:$0xe]  ;;  %v1359_v10 = vor.u32 %v1358_v36, %v4834_v25  ;;  %v2504_v6 = vrot.slane %v4654_v16, 5  ;;  %v3288_v43 = vcombine.low %v2484_v53, %v2487_v57  ;;  %v2500_v11 = vrot.slane %v4685_v50, 5 }
  0xac   : > { %3534 = vmatprep.mubr.msk.bf16.mxu0 %vm481_vm3, %v3260_v18  ;;  %v3281_v45 = vrot.slane %v3273_v52, 9  ;;  %v1391_v15 = vshrl.u32 %v3138_v26, 16  ;;  %v1394_v41 = vshll.u32 %v3138_v26, 16  ;;  %v1400_v28 = vshll.u32 %v4415_v20, 16  ;;  %v3801_v52 = vld [vmem:[%s4089_s11 + $0x60] sm:$0xff]  }
  0xad   : > { %3451 = vmatmul.mubr.msk.bf16.vlgmr.msra.gmra.mrb[0].mxu1 %vm481_vm3, %v3795_v59  ;;  %v1404_v59 = vshrl.u32 %v4415_v20, 16  ;;  %v3289_v18 = vcombine.low %v2491_v23, %v2494_v55  ;;  %v2499_v4 = vrot.slane %v2497_v31, 4  ;;  %v1364_v47 = vrot.slane %v1362_v39, 5 }
  0xae   : > { %3454 = vmatprep.mubr.msk.bf16.mxu1 %vm481_vm3, %v3796_v51  ;;  %3557 = vmatpush3.bf16.msra.mxu1 %v4072_v2  ;;  %v3797_v2 = vld [vmem:[%s4089_s11 + $0x30] sm:$0xff]   ;;  %v3282_v51 = vrot.slane %v3274_v38, 9  ;;  %v1350_v16 = vrot.slane %v1349_v19, 4  ;;  %v1360_v49 = vrot.slane %v1359_v10, 4  ;;  %v2506_v30 = vrot.slane %v2504_v6, 4 }
  0xaf   : > { %v2507_v58 = vrot.slane %v4690_v63, 5  ;;  %v1393_v50 = vrot.slane %v1391_v15, 4  ;;  %v1396_v54 = vrot.slane %v1394_v41, 5  ;;  %v1402_v48 = vrot.slane %v1400_v28, 5 }
  0xb0   : > { %v1406_v62 = vrot.slane %v1404_v59, 4  ;;  %v2498_v20 = vsel %vm4283_vm7, %v3281_v45, %v2497_v31  ;;  %v2501_v1 = vsel %vm4283_vm7, %v2499_v4, %v2500_v11  ;;  %v2505_v35 = vsel %vm4283_vm7, %v3282_v51, %v2504_v6 }
  0xb1   : > { %v2511_v63 = vrot.slane %v4675_v46, 5  ;;  %v1355_v14 = vsel %vm4128_vm4, %v1350_v16, %v4834_v25  ;;  %v1365_v40 = vsel %vm4128_vm4, %v1360_v49, %v1364_v47  ;;  %v2508_v13 = vsel %vm4283_vm7, %v2506_v30, %v2507_v58  ;;  %v3276_v46 = vld [vmem:[%s4089_s11 + $0x60] sm:$0xe]  ;;  %v3277_v47 = vld [vmem:[%s4089_s11 + $0x6c] sm:$0xe]  ;;  %s3304_s11 = sshll.u32 %s3945_s19, 1 }
  0xb2   : > { %v1415_v34 = vshrl.u32 %v3141_v29, 16  ;;  %v1418_v3 = vshll.u32 %v3141_v29, 16  ;;  %v1428_v44 = vshrl.u32 %v5183_v9, 16  ;;  %v3290_v42 = vcombine.low %v2498_v20, %v2501_v1  ;;  %s5010_s27 = sadd.s32 %s3941_s18, %s3304_s11  ;;  %s2878_s18 = sshll.u32 %s5164_s8, 4  ;;  %s5036_s18 = int_to_ptr.vmem [resolvable:$true] %s2878_s18 }
  0xb3   : > { %3535 = vmatmul.mubr.msk.bf16.gmra.mrb[12].mxu0 %vm481_vm3, %v3261_v61  ;;  %v1424_v61 = vshll.u32 %v5183_v9, 16  ;;  %v1407_v7 = vor.u32 %v1406_v62, %v1402_v48  ;;  %v1410_v25 = vshll.u32 %v5184_v33, 16  ;;  %v3291_v36 = vcombine.low %v2505_v35, %v2508_v13  ;;  %s3307_s19 = sshll.u32 %s5010_s27, 4  ;;  %s3803_s8 = scalar_lea.vmem %s5028_s6, 16 }
  0xb4   : > { %3540 = vmatprep.mubr.msk.bf16.mxu0 %vm481_vm3, %v3287_v0  ;;  %v2518_v0 = vrot.slane %v5182_v8, 5  ;;  %v2513_v53 = vrot.slane %v2511_v63, 4  ;;  %v2514_v57 = vrot.slane %v4728_v56, 5  ;;  %v3149_v23 = vcombine.low %v1355_v14, %v1365_v40  ;;  %s5026_s23 = scalar_lea.hbm %s5156_s3, %s3307_s19  ;;  %s5034_s11 = scalar_lea.hbm %s5157_s4, %s3307_s19 }
  0xb5   : > { %3455 = vmatmul.mubr.msk.bf16.gmra.mrb[4].mxu1 %vm481_vm3, %v3797_v2  ;;  %v1397_v2 = vor.u32 %v1396_v54, %v1393_v50  ;;  %v3284_v31 = vrot.slane %v3276_v46, 9  ;;  %v2521_v26 = vrot.slane %v4749_v27, 5  ;;  %v1417_v55 = vrot.slane %v1415_v34, 4  ;;  %p3804_p13 = scmp.ne.s32.totalorder %s5028_s6, %s3803_s8  ;;  %p3811_p4 = scmp.lt.s32.totalorder %s3809_s0, %s3803_s8 }
  0xb6   : > { %3458 = vmatprep.mubr.msk.bf16.mxu1 %vm481_vm3, %v3798_v22  ;;  %v3283_v22 = vrot.slane %v3275_v37, 9  ;;  %v2520_v39 = vrot.slane %v2518_v0, 4  ;;  %v1420_v19 = vrot.slane %v1418_v3, 5  ;;  %v1426_v10 = vrot.slane %v1424_v61, 5 }
  0xb7   : > { %v1430_v38 = vrot.slane %v1428_v44, 4  ;;  %v1398_v6 = vrot.slane %v1397_v2, 4  ;;  %v1412_v45 = vrot.slane %v1410_v25, 5  ;;  %v2515_v27 = vsel %vm4283_vm7, %v2513_v53, %v2514_v57  ;;  %p3805_p0 = pnand %p3804_p13, %p4040_p3  ;;  %p3812_p5 = por %p3811_p4, %p3810_p2 }
  0xb8   : > { %v2512_v56 = vsel %vm4283_vm7, %v3283_v22, %v2511_v63  ;;  %v2519_v11 = vsel %vm4283_vm7, %v3284_v31, %v2518_v0  ;;  %v2525_v15 = vrot.slane %v4737_v12, 5  ;;  %v2522_v41 = vsel %vm4283_vm7, %v2520_v39, %v2521_v26 }
  0xb9   : > { %v1421_v28 = vor.u32 %v1420_v19, %v1417_v55  ;;  %v1431_v59 = vor.u32 %v1430_v38, %v1426_v10  ;;  %v1403_v51 = vsel %vm4128_vm4, %v1398_v6, %v1402_v48  ;;  %v3292_v16 = vcombine.low %v2512_v56, %v2515_v27  ;;  %p3806_p1 = pneg %p3805_p0 }
  0xba   : > { %v3293_v49 = vcombine.low %v2519_v11, %v2522_v41  ;;  %v3285_v30 = vrot.slane %v3277_v47, 9  ;;  %v2527_v12 = vrot.slane %v2525_v15, 4  ;;  %v2528_v58 = vrot.slane %v4778_v60, 5 }
  0xbb   : > { %3541 = vmatmul.mubr.msk.bf16.vlgmr.msra.gmra.mrb[0].mxu0 %vm481_vm3, %v3288_v43  ;;  %v1408_v43 = vrot.slane %v1407_v7, 4  ;;  %v1422_v50 = vrot.slane %v1421_v28, 4  ;;  %v1432_v54 = vrot.slane %v1431_v59, 4  ;;  %p3813_p6 = pnand %p3812_p5, %p3806_p1 }
  0xbc   : > { %3544 = vmatprep.mubr.msk.bf16.mxu0 %vm481_vm3, %v3289_v18  ;;  %v5185_v18 = vld [vmem:[#allocation11_spill] sm:$0xff]  ;;  %v2526_v48 = vsel %vm4283_vm7, %v3285_v30, %v2525_v15  ;;  %v2529_v29 = vsel %vm4283_vm7, %v2527_v12, %v2528_v58 }
  0xbd   : > { %3459 = vmatmul.mubr.msk.bf16.gmra.mrb[8].mxu1 %vm481_vm3, %v3799_v17  ;;  %v1434_v4 = vshll.u32 %v5185_v18, 16  ;;  %v1413_v17 = vsel %vm4128_vm4, %v1408_v43, %v1412_v45  ;;  %v1427_v60 = vsel %vm4128_vm4, %v1422_v50, %v1426_v10  ;;  %v3294_v1 = vcombine.low %v2526_v48, %v2529_v29 }
  0xbe   : > { %3462 = vmatprep.mubr.msk.bf16.mxu1 %vm481_vm3, %v3800_v24  ;;  %v3151_v24 = vcombine.low %v1403_v51, %v1413_v17 }
  0xbf   : > { %v1436_v62 = vrot.slane %v1434_v4, 5 }
  0xc1   : > { %v1437_v20 = vsel %vm4128_vm4, %v1432_v54, %v1436_v62 }
  0xc2   : > { %v3152_v35 = vcombine.low %v1427_v60, %v1437_v20 }
  0xc3   : > { %3545 = vmatmul.mubr.msk.bf16.gmra.mrb[4].mxu0 %vm481_vm3, %v3290_v42 }
  0xc4   : > { %3548 = vmatprep.mubr.msk.bf16.mxu0 %vm481_vm3, %v3291_v36 }
  0xc5   : > { %3463 = vmatmul.mubr.msk.bf16.gmra.mrb[12].mxu1 %vm481_vm3, %v3801_v52 }
  0xc6   : > { %3476 = vmatprep.mubr.msk.bf16.mxu1 %vm481_vm3, %v3149_v23 }
  0xcb   : > { %3549 = vmatmul.mubr.msk.bf16.gmra.mrb[8].mxu0 %vm481_vm3, %v3292_v16 }
  0xcc   : > { %3552 = vmatprep.mubr.msk.bf16.mxu0 %vm481_vm3, %v3293_v49 }
  0xcd   : > { %3477 = vmatmul.mubr.msk.bf16.vlgmr.msra.gmra.mrb[8].mxu1 %vm481_vm3, %v4831_v21 }
  0xce   : > { %3480 = vmatprep.mubr.msk.bf16.mxu1 %vm481_vm3, %v3151_v24 }
  0xd3   : > { %3553 = vmatmul.mubr.msk.bf16.gmra.mrb[12].mxu0 %vm481_vm3, %v3294_v1 }
  0xd5   : > { %3481 = vmatmul.mubr.msk.bf16.gmra.mrb[12].mxu1 %vm481_vm3, %v3152_v35 }
 0x180   : > { %v3452_v21 = vpop.f32.mrb[0].mxu1 }
 0x181   : > { %v1143_v63 = vpop.f32.mrb[1].mxu1 }
 0x182   : > { %v3453_v14 = vpop.f32.mrb[2].mxu1 }
 0x183   : > { %v1146_v40 = vpop.f32.mrb[3].mxu1 }
 0x188   : > { %v3456_v5 = vpop.f32.mrb[4].mxu1 }
 0x189   : > { %v1159_v13 = vpop.f32.mrb[5].mxu1 }
 0x18a   : > { %v3457_v37 = vpop.f32.mrb[6].mxu1 }
 0x18b   : > { %v1162_v8 = vpop.f32.mrb[7].mxu1 }
 0x18e   : > { %v3542_v0 = vpop.f32.mrb[0].mxu0 }
 0x18f   : > { %v3558_v46 = vadd.f32 %v3542_v0, %v3452_v21  ;;  %v2617_v34 = vpop.f32.mrb[1].mxu0 }
 0x190   : > { %v3559_v3 = vadd.f32 %v2617_v34, %v1143_v63  ;;  %v3543_v32 = vpop.f32.mrb[2].mxu0 }
 0x191   : > { %v3560_v9 = vadd.f32 %v3543_v32, %v3453_v14  ;;  %v2620_v61 = vpop.f32.mrb[3].mxu0  ;;  %v2738_v2 = vmul.f32 %v3558_v46, %v3558_v46  ;;  %v2700_v53 = vsel %vm2696_vm8, %v3558_v46, 0.0 }
 0x192   : > { %v2736_v44 = vmul.f32 %v3559_v3, %v3559_v3  ;;  %v3561_v42 = vadd.f32 %v2620_v61, %v1146_v40  ;;  %2790 = vxpose.xlu0.b32.start [1/16] (narrow) %v3559_v3, 8  ;;  %v2697_v7 = vsel %vm2696_vm8, %v3559_v3, 0.0 }
 0x193   : > { %v2739_v36 = vmul.f32 %v3560_v9, %v3560_v9  ;;  %v2755_v19 = vsel %vm2696_vm8, %v2738_v2, 0.0  ;;  %v2702_v10 = vsel %vm2696_vm8, %v3560_v9, 0.0 }
 0x194   : > { %v2698_v33 = vsel %vm2696_vm8, %v3561_v42, 0.0  ;;  %v2737_v25 = vmul.f32 %v3561_v42, %v3561_v42  ;;  %v2752_v57 = vsel %vm2696_vm8, %v2736_v44, 0.0 }
 0x195   : > { %v2699_v22 = vadd.f32 %v2698_v33, %v2697_v7  ;;  %v2757_v43 = vsel %vm2696_vm8, %v2739_v36, 0.0 }
 0x196   : > { %v2753_v52 = vsel %vm2696_vm8, %v2737_v25, 0.0  ;;  %v3546_v23 = vpop.f32.mrb[4].mxu0  ;;  %2791 = vxpose.xlu0.b32.cont [2/16] (narrow) %v3561_v42, 8 }
 0x197   : > { %v2701_v31 = vadd.f32 %v2700_v53, %v2699_v22  ;;  %v2754_v39 = vadd.f32 %v2753_v52, %v2752_v57  ;;  %v4930_v26 = vadd.f32 %v3546_v23, %v3456_v5  ;;  %v2633_v55 = vpop.f32.mrb[5].mxu0 }
 0x198   : > { %v3563_v38 = vadd.f32 %v2633_v55, %v1159_v13  ;;  %v3547_v6 = vpop.f32.mrb[6].mxu0 }
 0x199   : > { %v2756_v45 = vadd.f32 %v2755_v19, %v2754_v39  ;;  %v2703_v56 = vadd.f32 %v2702_v10, %v2701_v31  ;;  %v2636_v27 = vpop.f32.mrb[7].mxu0  ;;  %v4936_v41 = vadd.f32 %v3547_v6, %v3457_v37  ;;  %v2742_v51 = vmul.f32 %v4930_v26, %v4930_v26 }
 0x19a   : > { %v2704_v11 = vsel %vm2696_vm8, %v3563_v38, 0.0  ;;  %v2740_v15 = vmul.f32 %v3563_v38, %v3563_v38  ;;  %v3565_v28 = vadd.f32 %v2636_v27, %v1162_v8  ;;  %2792 = vxpose.xlu0.b32.cont [3/16] (narrow) %v3558_v46, 8  ;;  %v2708_v30 = vsel %vm2696_vm8, %v4930_v26, 0.0 }
 0x19b   : > { %v2705_v59 = vadd.f32 %v2704_v11, %v2703_v56  ;;  %v2758_v18 = vadd.f32 %v2757_v43, %v2756_v45  ;;  %v2743_v58 = vmul.f32 %v4936_v41, %v4936_v41  ;;  %v2710_v48 = vsel %vm2696_vm8, %v4936_v41, 0.0 }
 0x19c   : > { %v2759_v4 = vsel %vm2696_vm8, %v2740_v15, 0.0  ;;  %v2706_v47 = vsel %vm2696_vm8, %v3565_v28, 0.0  ;;  %v2741_v49 = vmul.f32 %v3565_v28, %v3565_v28  ;;  %v2763_v35 = vsel %vm2696_vm8, %v2742_v51, 0.0 }
 0x19d   : > { %v2760_v17 = vadd.f32 %v2759_v4, %v2758_v18  ;;  %v2707_v16 = vadd.f32 %v2706_v47, %v2705_v59  ;;  %v2765_v8 = vsel %vm2696_vm8, %v2743_v58, 0.0 }
 0x19e   : > { %v3550_v12 = vpop.f32.mrb[8].mxu0  ;;  %2793 = vxpose.xlu0.b32.cont [4/16] (narrow) %v3560_v9, 8  ;;  %v2761_v50 = vsel %vm2696_vm8, %v2741_v49, 0.0 }
 0x19f   : > { %v2709_v24 = vadd.f32 %v2708_v30, %v2707_v16  ;;  %v2649_v62 = vpop.f32.mrb[9].mxu0  ;;  %v2762_v29 = vadd.f32 %v2761_v50, %v2760_v17 }
 0x1a0   : > { %v3478_v54 = vpop.f32.mrb[8].mxu1  ;;  %v3551_v1 = vpop.f32.mrb[10].mxu0 }
 0x1a1   : > { %v4949_v60 = vadd.f32 %v3550_v12, %v3478_v54  ;;  %v1557_v20 = vpop.f32.mrb[9].mxu1  ;;  %v2711_v63 = vadd.f32 %v2710_v48, %v2709_v24  ;;  %v2652_v40 = vpop.f32.mrb[11].mxu0  ;;  %v2764_v5 = vadd.f32 %v2763_v35, %v2762_v29 }
 0x1a2   : > { %v4952_v21 = vadd.f32 %v2649_v62, %v1557_v20  ;;  %v3479_v14 = vpop.f32.mrb[10].mxu1  ;;  %2794 = vxpose.xlu0.b32.cont [5/16] (narrow) %v3563_v38, 8 }
 0x1a3   : > { %v4954_v13 = vadd.f32 %v3551_v1, %v3479_v14  ;;  %v1560_v37 = vpop.f32.mrb[11].mxu1  ;;  %v2766_v32 = vadd.f32 %v2765_v8, %v2764_v5  ;;  %v2746_v9 = vmul.f32 %v4949_v60, %v4949_v60  ;;  %v2716_v36 = vsel %vm2696_vm8, %v4949_v60, 0.0 }
 0x1a4   : > { %v2712_v0 = vsel %vm2696_vm8, %v4952_v21, 0.0  ;;  %v2744_v46 = vmul.f32 %v4952_v21, %v4952_v21  ;;  %v3569_v34 = vadd.f32 %v2652_v40, %v1560_v37 }
 0x1a5   : > { %v2713_v3 = vadd.f32 %v2712_v0, %v2711_v63  ;;  %v2747_v7 = vmul.f32 %v4954_v13, %v4954_v13  ;;  %v2771_v19 = vsel %vm2696_vm8, %v2746_v9, 0.0  ;;  %v2718_v10 = vsel %vm2696_vm8, %v4954_v13, 0.0 }
 0x1a6   : > { %v2767_v61 = vsel %vm2696_vm8, %v2744_v46, 0.0  ;;  %v2714_v44 = vsel %vm2696_vm8, %v3569_v34, 0.0  ;;  %v2745_v42 = vmul.f32 %v3569_v34, %v3569_v34  ;;  %v3554_v25 = vpop.f32.mrb[12].mxu0  ;;  %2795 = vxpose.xlu0.b32.cont [6/16] (narrow) %v3565_v28, 8 }
 0x1a7   : > { %v2768_v2 = vadd.f32 %v2767_v61, %v2766_v32  ;;  %v2715_v33 = vadd.f32 %v2714_v44, %v2713_v3  ;;  %v2665_v57 = vpop.f32.mrb[13].mxu0  ;;  %v2773_v45 = vsel %vm2696_vm8, %v2747_v7, 0.0 }
 0x1a8   : > { %v2769_v22 = vsel %vm2696_vm8, %v2745_v42, 0.0  ;;  %v3482_v53 = vpop.f32.mrb[12].mxu1  ;;  %v3555_v55 = vpop.f32.mrb[14].mxu0 }
 0x1a9   : > { %v2717_v52 = vadd.f32 %v2716_v36, %v2715_v33  ;;  %v2770_v23 = vadd.f32 %v2769_v22, %v2768_v2  ;;  %v4970_v31 = vadd.f32 %v3554_v25, %v3482_v53  ;;  %v1573_v39 = vpop.f32.mrb[13].mxu1  ;;  %v2668_v43 = vpop.f32.mrb[15].mxu0 }
 0x1aa   : > { %v4975_v38 = vadd.f32 %v2665_v57, %v1573_v39  ;;  %v3483_v6 = vpop.f32.mrb[14].mxu1  ;;  %2796 = vxpose.xlu0.b32.cont [7/16] (narrow) %v4930_v26, 8 }
 0x1ab   : > { %v2772_v56 = vadd.f32 %v2771_v19, %v2770_v23  ;;  %v2719_v27 = vadd.f32 %v2718_v10, %v2717_v52  ;;  %v1576_v11 = vpop.f32.mrb[15].mxu1  ;;  %v4983_v59 = vadd.f32 %v3555_v55, %v3483_v6  ;;  %v2750_v26 = vmul.f32 %v4970_v31, %v4970_v31 }
 0x1ac   : > { %v2720_v15 = vsel %vm2696_vm8, %v4975_v38, 0.0  ;;  %v2748_v28 = vmul.f32 %v4975_v38, %v4975_v38  ;;  %v4985_v18 = vadd.f32 %v2668_v43, %v1576_v11  ;;  %v2724_v12 = vsel %vm2696_vm8, %v4970_v31, 0.0 }
 0x1ad   : > { %v2721_v4 = vadd.f32 %v2720_v15, %v2719_v27  ;;  %v2774_v47 = vadd.f32 %v2773_v45, %v2772_v56  ;;  %v2751_v58 = vmul.f32 %v4983_v59, %v4983_v59  ;;  %v2726_v54 = vsel %vm2696_vm8, %v4983_v59, 0.0 }
 0x1ae   : > { %v2775_v51 = vsel %vm2696_vm8, %v2748_v28, 0.0  ;;  %v2722_v17 = vsel %vm2696_vm8, %v4985_v18, 0.0  ;;  %v2749_v30 = vmul.f32 %v4985_v18, %v4985_v18  ;;  %2797 = vxpose.xlu0.b32.cont [8/16] (narrow) %v4936_v41, 8  ;;  %v2779_v48 = vsel %vm2696_vm8, %v2750_v26, 0.0 }
 0x1af   : > { %v2776_v16 = vadd.f32 %v2775_v51, %v2774_v47  ;;  %v2723_v49 = vadd.f32 %v2722_v17, %v2721_v4  ;;  %v2781_v20 = vsel %vm2696_vm8, %v2751_v58, 0.0 }
 0x1b0   : > { %v2777_v50 = vsel %vm2696_vm8, %v2749_v30, 0.0 }
 0x1b1   : > { %v2725_v24 = vadd.f32 %v2724_v12, %v2723_v49  ;;  %v2778_v62 = vadd.f32 %v2777_v50, %v2776_v16 }
 0x1b2   : > { %2798 = vxpose.xlu0.b32.cont [9/16] (narrow) %v4952_v21, 8 }
 0x1b3   : > { %v2727_v29 = vadd.f32 %v2726_v54, %v2725_v24  ;;  %v2780_v41 = vadd.f32 %v2779_v48, %v2778_v62 }
 0x1b5   : > { %v2728_v1 = vrot.slane %v2727_v29, 4  ;;  %v2782_v35 = vadd.f32 %v2781_v20, %v2780_v41 }
 0x1b6   : > { %2799 = vxpose.xlu0.b32.cont [10/16] (narrow) %v3569_v34, 8 }
 0x1b7   : > { %v2729_v63 = vadd.f32 %v2728_v1, %v2727_v29  ;;  %v2783_v14 = vrot.slane %v2782_v35, 4 }
 0x1b9   : > { %v2730_v40 = vrot.slane %v2729_v63, 2  ;;  %v2784_v5 = vadd.f32 %v2783_v14, %v2782_v35 }
 0x1ba   : > { %2800 = vxpose.xlu0.b32.cont [11/16] (narrow) %v4949_v60, 8 }
 0x1bb   : > { %v2731_v21 = vadd.f32 %v2730_v40, %v2729_v63  ;;  %v2785_v37 = vrot.slane %v2784_v5, 2 }
 0x1bd   : > { %v2732_v8 = vrot.slane %v2731_v21, 1  ;;  %v2786_v0 = vadd.f32 %v2785_v37, %v2784_v5 }
 0x1be   : > { %2801 = vxpose.xlu0.b32.cont [12/16] (narrow) %v4954_v13, 8 }
 0x1bf   : > { %v2733_v46 = vadd.f32 %v2732_v8, %v2731_v21  ;;  %v2787_v60 = vrot.slane %v2786_v0, 1 }
 0x1c1   : > { %2735 = vst.msk [vmem:[%s218_s5] sm:$0x1] %vm2734_vm9, %v2733_v46 }
 0x1c2   : > { %3816 = shalt.err (!%p3813_p6)
}
 0x1c3   : > { %s3817_s19 = scalar_lea.hbm %s5026_s23, 16  ;;  %s3821_s13 = scalar_lea.hbm %s5156_s3, 64 }
 0x1c4   : > { %p3818_p7 = scmp.ne.s32.totalorder %s5026_s23, %s3817_s19  ;;  %p3822_p11 = scmp.lt.u32.totalorder %s5026_s23, %s5156_s3 }
 0x1c5   : > { %p3823_p12 = scmp.lt.u32.totalorder %s3821_s13, %s3817_s19  ;;  %p3825_p0 = scmp.lt.u32.totalorder %s3817_s19, %s5026_s23 }
 0x1c6   : > { %p3819_p9 = pnand %p3818_p7, %p4040_p3 }
 0x1c7   : > { %p3824_p13 = por %p3823_p12, %p3822_p11 }
 0x1c8   : > { %p3820_p10 = pneg %p3819_p9 }
 0x1c9   : > { %p3826_p1 = por %p3825_p0, %p3824_p13 }
 0x1cb   : > { %p3827_p2 = pnand %p3826_p1, %p3820_p10 }
 0x1cd   : > { %3830 = shalt.err (!%p3827_p2)
}
 0x1ce   : > { %3698 = dma.vmem_to_hbm [thread:$0]  (%p4040_p3), %s5028_s6, 16, %s5026_s23, %s2830_s24   ;;  %v2788_v13 = vadd.f32 %v2787_v60, %v2786_v0  ;;  %2802 = vxpose.xlu0.b32.cont [13/16] (narrow) %v4975_v38, 8 }
 0x1cf   : > { %s5186_s0 = scalar_lea.vmem [#allocation6], %s5007_s14  ;;  %s3831_s8 = scalar_lea.vmem %s5036_s18, 16 }
 0x1d0   : > { %2789 = vst.msk [vmem:[%s5186_s0] sm:$0x1] %vm2734_vm9, %v2788_v13  ;;  %p3832_p4 = scmp.ne.s32.totalorder %s5036_s18, %s3831_s8  ;;  %s3960_s19 = smov [#allocation6]  }
 0x1d1   : > { %s3835_s5 = sshll.u32 %s3960_s19, 4  ;;  %s3836_s5 = int_to_ptr.vmem [resolvable:$false] %s3835_s5 }
 0x1d2   : > { %p3833_p5 = pnand %p3832_p4, %p4040_p3  ;;  %s3837_s12 = scalar_lea.vmem %s3836_s5, 32 }
 0x1d3   : > { %p3838_p7 = scmp.lt.s32.totalorder %s5036_s18, %s3836_s5  ;;  %p3839_p9 = scmp.lt.s32.totalorder %s3837_s12, %s3831_s8 }
 0x1d4   : > { %p3834_p6 = pneg %p3833_p5 }
 0x1d5   : > { %p3840_p10 = por %p3839_p9, %p3838_p7 }
 0x1d7   : > { %p3841_p11 = pnand %p3840_p10, %p3834_p6 }
 0x1d9   : > { %3844 = shalt.err (!%p3841_p11)
}
 0x1da   : > { %s3845_s6 = scalar_lea.hbm %s5034_s11, 16  ;;  %s3849_s9 = scalar_lea.hbm %s5157_s4, 64 }
 0x1db   : > { %p3846_p12 = scmp.ne.s32.totalorder %s5034_s11, %s3845_s6  ;;  %p3850_p1 = scmp.lt.u32.totalorder %s5034_s11, %s5157_s4 }
 0x1dc   : > { %p3851_p2 = scmp.lt.u32.totalorder %s3849_s9, %s3845_s6  ;;  %p3853_p5 = scmp.lt.u32.totalorder %s3845_s6, %s5034_s11 }
 0x1dd   : > { %p3847_p13 = pnand %p3846_p12, %p4040_p3 }
 0x1de   : > { %p3852_p4 = por %p3851_p2, %p3850_p1 }
 0x1df   : > { %p3848_p0 = pneg %p3847_p13 }
 0x1e0   : > { %p3854_p6 = por %p3853_p5, %p3852_p4 }
 0x1e2   : > { %p3855_p7 = pnand %p3854_p6, %p3848_p0 }
 0x1e4   : > { %3858 = shalt.err (!%p3855_p7)
}
 0x1e5   : > { %3699 = dma.vmem_to_hbm [thread:$0]  (%p4040_p3), %s5036_s18, 16, %s5034_s11, %s2830_s24   ;;  %2803 = vxpose.xlu0.b32.cont [14/16] (narrow) %v4985_v18, 8 }
 0x1e6   : > { %s3022_s8 = sshll.u32 %s5007_s14, 2  ;;  %s3305_s19 = sshll.u32 %s5010_s27, 6 }
 0x1e7   : > { %s212_s5 = scalar_lea.vmem [#allocation2], %s3022_s8  ;;  %s5097_s23 = scalar_lea.hbm %s5155_s2, %s3305_s19 }
 0x1e8   : > { %s2848_s12 = sshll.u32 %s212_s5, 4  ;;  %s2825_s24 = scalar_lea.sflag [#allocation3], %s5007_s14  ;;  %s5099_s12 = int_to_ptr.vmem [resolvable:$true] %s2848_s12 }
 0x1e9   : > { %2804 = vxpose.xlu0.b32.cont [15/16] (narrow) %v4970_v31, 8  ;;  %s3859_s18 = scalar_lea.vmem %s5099_s12, 64  ;;  %s3961_s27 = smov [#allocation2]  }
 0x1ea   : > { %p3860_p9 = scmp.ne.s32.totalorder %s5099_s12, %s3859_s18  ;;  %s3863_s11 = sshll.u32 %s3961_s27, 4  ;;  %s3864_s11 = int_to_ptr.vmem [resolvable:$false] %s3863_s11 }
 0x1eb   : > { %s3865_s13 = scalar_lea.vmem %s3864_s11, 128  ;;  %p3866_p12 = scmp.lt.s32.totalorder %s5099_s12, %s3864_s11 }
 0x1ec   : > { %p3861_p10 = pnand %p3860_p9, %p4040_p3  ;;  %p3867_p13 = scmp.lt.s32.totalorder %s3865_s13, %s3859_s18 }
 0x1ed   : > { %2805 = vxpose.xlu0.b32.end [16/16] (narrow) %v4983_v59, 8 }
 0x1ee   : > { %p3862_p11 = pneg %p3861_p10  ;;  %p3868_p0 = por %p3867_p13, %p3866_p12 }
 0x1f0   : > { %p3869_p1 = pnand %p3868_p0, %p3862_p11 }
 0x231   : > { %v2806_v34 = vpop.trf.xlu0 }
 0x232   : > { %v2822_v3 = vpack.c.bf16 %v2806_v34, %v2806_v34 }
 0x234   : > { %2823 = vst [vmem:[%s212_s5] sm:$0xf] %v2822_v3 }
 0x235   : > { %3872 = shalt.err (!%p3869_p1)
}
 0x236   : > { %s3873_s14 = scalar_lea.hbm %s5097_s23, 64  ;;  %s3877_s0 = scalar_lea.hbm %s5155_s2, 256 }
 0x237   : > { %p3874_p2 = scmp.ne.s32.totalorder %s5097_s23, %s3873_s14  ;;  %p3878_p6 = scmp.lt.u32.totalorder %s5097_s23, %s5155_s2 }
 0x238   : > { %p3879_p7 = scmp.lt.u32.totalorder %s3877_s0, %s3873_s14  ;;  %p3881_p10 = scmp.lt.u32.totalorder %s3873_s14, %s5097_s23 }
 0x239   : > { %p3875_p4 = pnand %p3874_p2, %p4040_p3 }
 0x23a   : > { %p3880_p9 = por %p3879_p7, %p3878_p6 }
 0x23b   : > { %p3876_p5 = pneg %p3875_p4 }
 0x23c   : > { %p3882_p11 = por %p3881_p10, %p3880_p9 }
 0x23e   : > { %p3883_p12 = pnand %p3882_p11, %p3876_p5 }
 0x240   : > { %3886 = shalt.err (!%p3883_p12)
}
 0x241   : > { %3697 = dma.vmem_to_hbm [thread:$0]  (%p4040_p3), %s5099_s12, 64, %s5097_s23, %s2825_s24  }
 0x242 PF: > { %p3713_p13 = scmp.ge.s32.totalorder %s3957_s22, 2  ;;  %s2890_s5 = sand.u32 1, %s3929_s15  }
 0x243   : > { %s2891_s30 = scalar_lea.sflag [#allocation3], %s2890_s5 }
 0x244   : > { %p3704_p0 = pnand %p3713_p13, %p4051_p8 }
 0x246   : > { %3920 = dma.done.wait (!%p3704_p0), %s2891_s30, 64  }
 0x247   : > { %3922 = vsyncadd (!%p3704_p0), %s2891_s30, 4294967232  ;;  %s5187_s6 = sadd.s32 4294967294, %s3957_s22  }
 0x248   : > { %s2899_s18 = sand.u32 1, %s5187_s6  }
 0x249   : > { %s2900_s27 = scalar_lea.sflag [#allocation5], %s2899_s18 }
 0x24a   : > { %3924 = dma.done.wait (!%p3704_p0), %s2900_s27, 32  }
 0x24b   : > { %3926 = vsyncadd (!%p3704_p0), %s2900_s27, 4294967264  ;;  %s21_s22 = sadd.s32 1, %s3957_s22   ;;  %s5188_s15 = smov %s3933_s16 }
 0x24c   : > { %p18_p3 = scmp.ge.s32.totalorder %s21_s22, 6   ;;  %s5189_s16 = smov %s3937_s17 }
 0x24d   : > { %s5190_s17 = smov %s4060_s7  ;;  %s5191_s18 = smov %s3949_s20 }
 0x24e   : > { %s5192_s19 = smov %s3953_s21  ;;  %s5193_s20 = smov %s5196_s25 }
 0x24f   : > { %s5194_s21 = smov %s5200_s26  ;;  %20 = sbr.rel (!%p18_p3) target bundleno = 9 (0x9), region = 106 }
 0x256   :  { %2912 = vsyncpa [#allocation3], 1 }
 0x257   :  { %2914 = vsyncpa [#allocation3 + $0x1], 1 }
 0x258   :  { %2915 = vsyncpa [#allocation5], 1 }
 0x259   :  { %2917 = vsyncpa [#allocation5 + $0x1], 1 }

</bundles_post_ra>
